<compile_context>
chip_gen: v6e
topology: v6e:2x2x1
jax: 0.10.0
libtpu: 0.0.40
codegen_flags: <defaults>
</compile_context>

<pallas_src>
import functools

import jax
import jax.numpy as jnp
from jax.experimental import pallas as pl
from jax.experimental.pallas import tpu as pltpu

INPUT_DIM = 1
HIDDEN_DIM = 32
OUTPUT_DIM = 1
NUM_LAYERS = 2          # hard-wired as two stacked cells in the kernel
_UNROLL_MAX_T = 32      # static Python unroll up to this many timesteps


def _lstm_kernel(x_ref,     # (Bt, T)    raw inputs (input_dim == 1, squeezed)
                 wih0_ref,  # (1, 4H)    layer-0 input weight (single row)
                 whh0_ref,  # (H, 4H)    layer-0 recurrent weight
                 b0_ref,    # (1, 4H)    layer-0 folded bias
                 wih1_ref,  # (H, 4H)    layer-1 input weight
                 whh1_ref,  # (H, 4H)    layer-1 recurrent weight
                 b1_ref,    # (1, 4H)    layer-1 folded bias
                 wfc_ref,   # (H, OUT)   final Linear weight
                 bfc_ref,   # (1, OUT)   final Linear bias
                 out_ref,   # (Bt, OUT)
                 *, seq_len, hidden, unrolled):
    H = hidden
    G = 4 * H
    Bt = x_ref.shape[0]
    f32 = jnp.float32

    # Weights loaded once; tiny, stay resident across the whole recurrence.
    whh0 = whh0_ref[...]
    wih1 = wih1_ref[...]
    whh1 = whh1_ref[...]
    # Hoist (1,4H)->(Bt,4H) broadcasts out of the loop (no CSE of broadcasts).
    wih0_b = jnp.broadcast_to(wih0_ref[...], (Bt, G))
    b0_b = jnp.broadcast_to(b0_ref[...], (Bt, G))
    b1_b = jnp.broadcast_to(b1_ref[...], (Bt, G))

    def apply_gates(gates, c):
        # 4H == 128 lanes == one vreg width: one sigmoid + one tanh over the
        # whole gates vreg, then static lane slices per gate.
        sig = jax.nn.sigmoid(gates)
        tnh = jnp.tanh(gates)
        i = sig[:, 0 * H:1 * H]
        f = sig[:, 1 * H:2 * H]
        g = tnh[:, 2 * H:3 * H]
        o = sig[:, 3 * H:4 * H]
        c_new = f * c + i * g
        h_new = o * jnp.tanh(c_new)
        return h_new, c_new

    def step(x_t, h0, c0, h1, c1):
        # Layer 0: input_dim == 1, so the input projection is a pure-VPU
        # broadcast-mul-add (x_t is (Bt, 1)); only h0 @ W_hh0 uses the MXU.
        g0 = x_t * wih0_b + b0_b + jnp.dot(
            h0, whh0, preferred_element_type=f32)
        h0, c0 = apply_gates(g0, c0)
        # Layer 1: two register-resident dots (no VMEM pack round trip).
        g1 = (jnp.dot(h0, wih1, preferred_element_type=f32)
              + jnp.dot(h1, whh1, preferred_element_type=f32)
              + b1_b)
        h1, c1 = apply_gates(g1, c1)
        return h0, c0, h1, c1

    # h = c = 0 for both layers (matches the PyTorch module's zero init).
    zeros = jnp.zeros((Bt, H), f32)
    carry = (zeros, zeros, zeros, zeros)

    if unrolled:
        # Short sequences: fully-unrolled static loop, static lane slices.
        for t in range(seq_len):
            carry = step(x_ref[:, t:t + 1], *carry)
    else:
        # Longer sequences: bound code size / vreg live ranges.
        # TODO(synk): if a Mosaic version rejects the dynamic width-1 lane
        # slice below, stage a time-major gate-input slab in VMEM instead.
        def body(t, c):
            return step(x_ref[:, pl.ds(t, 1)], *c)
        carry = jax.lax.fori_loop(0, seq_len, body, carry, unroll=4)

    h1_final = carry[2]
    # Final Linear on the last timestep's top-layer hidden state.
    # (OUTPUT_DIM=1 -> one masked store, but it happens once per tile.)
    out_ref[...] = (jnp.dot(h1_final, wfc_ref[...], preferred_element_type=f32)
                    + bfc_ref[...])


def _batch_tiling(batch):
    """(batch_tile, padded_batch): single tile for tiny batches, otherwise
    >= 2 tiles of up to 128 rows (fills the MXU and keeps both v7x TCs busy)."""
    if batch <= 8:
        return batch, batch
    if batch <= 256:
        tile = ((batch + 15) // 16) * 8     # ~half the batch, multiple of 8
    else:
        tile = 128
    padded = pl.cdiv(batch, tile) * tile
    return tile, padded


@jax.jit
def lstm_predictor(x, params):
    """x: (B, T, input_dim) float32, batch_first like the PyTorch module."""
    B, T, D = x.shape
    assert T >= 1, "empty sequence: output would be undefined"
    assert D == INPUT_DIM, "kernel assumes input_dim == 1"
    H = HIDDEN_DIM
    (wih0, whh0, b0, wih1, whh1, b1, wfc, bfc) = params

    batch_tile, b_pad = _batch_tiling(B)
    x2 = x[..., 0]                                   # (B, T); input_dim == 1
    if b_pad != B:
        # Zero-pad so padded rows stay finite through the recurrence; their
        # outputs are sliced off below.
        x2 = jnp.pad(x2, ((0, b_pad - B), (0, 0)))
    num_tiles = b_pad // batch_tile

    kernel = functools.partial(_lstm_kernel, seq_len=T, hidden=H,
                               unrolled=T <= _UNROLL_MAX_T)

    out = pl.pallas_call(
        kernel,
        out_shape=jax.ShapeDtypeStruct((b_pad, OUTPUT_DIM), jnp.float32),
        grid=(num_tiles,),
        in_specs=[
            pl.BlockSpec((batch_tile, T), lambda b: (b, 0)),        # x
            pl.BlockSpec((1, 4 * H), lambda b: (0, 0)),             # W_ih0
            pl.BlockSpec((H, 4 * H), lambda b: (0, 0)),             # W_hh0
            pl.BlockSpec((1, 4 * H), lambda b: (0, 0)),             # b0
            pl.BlockSpec((H, 4 * H), lambda b: (0, 0)),             # W_ih1
            pl.BlockSpec((H, 4 * H), lambda b: (0, 0)),             # W_hh1
            pl.BlockSpec((1, 4 * H), lambda b: (0, 0)),             # b1
            pl.BlockSpec((H, OUTPUT_DIM), lambda b: (0, 0)),        # fc W
            pl.BlockSpec((1, OUTPUT_DIM), lambda b: (0, 0)),        # fc b
        ],
        out_specs=pl.BlockSpec((batch_tile, OUTPUT_DIM), lambda b: (b, 0)),
        compiler_params=pltpu.CompilerParams(
            dimension_semantics=("parallel",)),      # batch tiles independent
    )(x2, wih0, whh0, b0, wih1, whh1, b1, wfc, bfc)
    return out[:B]


def init_params(key):
    """Deterministic init matching nn.LSTM / nn.Linear parameter shapes.

    PyTorch stores weight_ih_l* as (4H, in) and weight_hh_l* as (4H, H); we
    keep the transposed (right-multiply) form and fold bias_ih + bias_hh into
    a single (1, 4H) bias per layer.
    """
    H = HIDDEN_DIM
    k = 1.0 / jnp.sqrt(jnp.float32(H))
    keys = jax.random.split(key, 8)
    u = lambda kk, shape: jax.random.uniform(kk, shape, jnp.float32, -k, k)
    wih0 = u(keys[0], (INPUT_DIM, 4 * H))
    whh0 = u(keys[1], (H, 4 * H))
    b0 = u(keys[2], (1, 4 * H)) + u(keys[3], (1, 4 * H))   # bias_ih + bias_hh
    wih1 = u(keys[4], (H, 4 * H))
    whh1 = u(keys[5], (H, 4 * H))
    b1 = u(keys[6], (1, 4 * H)) + u(keys[7], (1, 4 * H))
    kfc_w, kfc_b = jax.random.split(jax.random.fold_in(key, 123))
    wfc = u(kfc_w, (H, OUTPUT_DIM))
    bfc = u(kfc_b, (1, OUTPUT_DIM))
    return (wih0, whh0, b0, wih1, whh1, b1, wfc, bfc)


def _reference(x, params):
    """Pure-JAX reference of the PyTorch forward (for a correctness check)."""
    (wih0, whh0, b0, wih1, whh1, b1, wfc, bfc) = params
    B, T, _ = x.shape
    H = HIDDEN_DIM
    h0 = jnp.zeros((B, H)); c0 = jnp.zeros((B, H))
    h1 = jnp.zeros((B, H)); c1 = jnp.zeros((B, H))

    def cell(x_in, h, c, wih, whh, b):
        g = x_in @ wih + h @ whh + b
        i = jax.nn.sigmoid(g[:, 0 * H:1 * H])
        f = jax.nn.sigmoid(g[:, 1 * H:2 * H])
        gg = jnp.tanh(g[:, 2 * H:3 * H])
        o = jax.nn.sigmoid(g[:, 3 * H:4 * H])
        c_new = f * c + i * gg
        return o * jnp.tanh(c_new), c_new

    for t in range(T):
        h0, c0 = cell(x[:, t, :], h0, c0, wih0, whh0, b0)
        h1, c1 = cell(h0, h1, c1, wih1, whh1, b1)
    return h1 @ wfc + bfc


if __name__ == "__main__":
    key = jax.random.PRNGKey(0)
    k_x, k_p = jax.random.split(key)

    B, T = 2, 8
    x = jax.random.normal(k_x, (B, T, INPUT_DIM), dtype=jnp.float32)
    params = init_params(k_p)

    out = jax.block_until_ready(lstm_predictor(x, params))

    ref = _reference(x, params)
    assert out.shape == (B, OUTPUT_DIM)
    assert jnp.allclose(out, ref, atol=1e-4, rtol=1e-4), (out, ref)

    print("KERNEL_OK")
</pallas_src>

<mosaic_0001>
module attributes {stable_mosaic.version = 11 : i64} {
  func.func @_lstm_kernel(%arg0: i32, %arg1: memref<2x8xf32, #tpu.memory_space<vmem>>, %arg2: memref<1x128xf32, #tpu.memory_space<vmem>>, %arg3: memref<32x128xf32, #tpu.memory_space<vmem>>, %arg4: memref<1x128xf32, #tpu.memory_space<vmem>>, %arg5: memref<32x128xf32, #tpu.memory_space<vmem>>, %arg6: memref<32x128xf32, #tpu.memory_space<vmem>>, %arg7: memref<1x128xf32, #tpu.memory_space<vmem>>, %arg8: memref<32x1xf32, #tpu.memory_space<vmem>>, %arg9: memref<1x1xf32, #tpu.memory_space<vmem>>, %arg10: memref<2x1xf32, #tpu.memory_space<vmem>>) attributes {dimension_semantics = [#tpu.dimension_semantics<parallel>], iteration_bounds = array<i64: 1>, scalar_prefetch = 0 : i64, scratch_operands = 0 : i64, tpu.core_type = #tpu.core_type<tc>, window_params = [{transform_indices = @transform_0, window_bounds = array<i64: 2, 8>}, {pipeline_mode = #tpu.pipeline_mode<synchronous>, transform_indices = @transform_1, window_bounds = array<i64: 1, 128>}, {pipeline_mode = #tpu.pipeline_mode<synchronous>, transform_indices = @transform_2, window_bounds = array<i64: 32, 128>}, {pipeline_mode = #tpu.pipeline_mode<synchronous>, transform_indices = @transform_3, window_bounds = array<i64: 1, 128>}, {pipeline_mode = #tpu.pipeline_mode<synchronous>, transform_indices = @transform_4, window_bounds = array<i64: 32, 128>}, {pipeline_mode = #tpu.pipeline_mode<synchronous>, transform_indices = @transform_5, window_bounds = array<i64: 32, 128>}, {pipeline_mode = #tpu.pipeline_mode<synchronous>, transform_indices = @transform_6, window_bounds = array<i64: 1, 128>}, {pipeline_mode = #tpu.pipeline_mode<synchronous>, transform_indices = @transform_7, window_bounds = array<i64: 32, 1>}, {pipeline_mode = #tpu.pipeline_mode<synchronous>, transform_indices = @transform_8, window_bounds = array<i64: 1, 1>}, {transform_indices = @transform_9, window_bounds = array<i64: 2, 1>}]} {
    %c0 = arith.constant 0 : index
    %c0_0 = arith.constant 0 : index
    %0 = vector.load %arg3[%c0, %c0_0] : memref<32x128xf32, #tpu.memory_space<vmem>>, vector<32x128xf32>
    %c0_1 = arith.constant 0 : index
    %c0_2 = arith.constant 0 : index
    %1 = vector.load %arg5[%c0_1, %c0_2] : memref<32x128xf32, #tpu.memory_space<vmem>>, vector<32x128xf32>
    %c0_3 = arith.constant 0 : index
    %c0_4 = arith.constant 0 : index
    %2 = vector.load %arg6[%c0_3, %c0_4] : memref<32x128xf32, #tpu.memory_space<vmem>>, vector<32x128xf32>
    %c0_5 = arith.constant 0 : index
    %c0_6 = arith.constant 0 : index
    %3 = vector.load %arg2[%c0_5, %c0_6] : memref<1x128xf32, #tpu.memory_space<vmem>>, vector<1x128xf32>
    %4 = vector.shape_cast %3 : vector<1x128xf32> to vector<1x128xf32>
    %5 = vector.broadcast %4 : vector<1x128xf32> to vector<2x128xf32>
    %c0_7 = arith.constant 0 : index
    %c0_8 = arith.constant 0 : index
    %6 = vector.load %arg4[%c0_7, %c0_8] : memref<1x128xf32, #tpu.memory_space<vmem>>, vector<1x128xf32>
    %7 = vector.shape_cast %6 : vector<1x128xf32> to vector<1x128xf32>
    %8 = vector.broadcast %7 : vector<1x128xf32> to vector<2x128xf32>
    %c0_9 = arith.constant 0 : index
    %c0_10 = arith.constant 0 : index
    %9 = vector.load %arg7[%c0_9, %c0_10] : memref<1x128xf32, #tpu.memory_space<vmem>>, vector<1x128xf32>
    %10 = vector.shape_cast %9 : vector<1x128xf32> to vector<1x128xf32>
    %11 = vector.broadcast %10 : vector<1x128xf32> to vector<2x128xf32>
    %cst = arith.constant 0.000000e+00 : f32
    %12 = vector.broadcast %cst : f32 to vector<2x32xf32>
    %c0_11 = arith.constant 0 : index
    %c0_12 = arith.constant 0 : index
    %13 = vector.load %arg1[%c0_11, %c0_12] : memref<2x8xf32, #tpu.memory_space<vmem>>, vector<2x1xf32>
    %14 = vector.broadcast %13 : vector<2x1xf32> to vector<2x128xf32>
    %15 = arith.mulf %14, %5 : vector<2x128xf32>
    %16 = arith.addf %15, %8 : vector<2x128xf32>
    %cst_13 = arith.constant dense<0.000000e+00> : vector<2x128xf32>
    %17 = tpu.matmul %12, %0, %cst_13 {dimension_numbers = #tpu.dot_dimension_numbers<[1], [0], [0], [1], [0, 0, 1, 1], [], []>} : vector<2x32xf32>, vector<32x128xf32>, vector<2x128xf32> -> vector<2x128xf32>
    %18 = arith.addf %16, %17 : vector<2x128xf32>
    %19 = arith.negf %18 : vector<2x128xf32>
    %20 = math.exp %19 : vector<2x128xf32>
    %cst_14 = arith.constant 1.000000e+00 : f32
    %21 = vector.broadcast %cst_14 : f32 to vector<2x128xf32>
    %22 = arith.addf %21, %20 : vector<2x128xf32>
    %23 = arith.divf %21, %22 : vector<2x128xf32>
    %24 = math.tanh %18 : vector<2x128xf32>
    %25 = vector.extract_strided_slice %23 {offsets = [0, 0], sizes = [2, 32], strides = [1, 1]} : vector<2x128xf32> to vector<2x32xf32>
    %26 = vector.extract_strided_slice %23 {offsets = [0, 32], sizes = [2, 32], strides = [1, 1]} : vector<2x128xf32> to vector<2x32xf32>
    %27 = vector.extract_strided_slice %24 {offsets = [0, 64], sizes = [2, 32], strides = [1, 1]} : vector<2x128xf32> to vector<2x32xf32>
    %28 = vector.extract_strided_slice %23 {offsets = [0, 96], sizes = [2, 32], strides = [1, 1]} : vector<2x128xf32> to vector<2x32xf32>
    %29 = arith.mulf %26, %12 : vector<2x32xf32>
    %30 = arith.mulf %25, %27 : vector<2x32xf32>
    %31 = arith.addf %29, %30 : vector<2x32xf32>
    %32 = math.tanh %31 : vector<2x32xf32>
    %33 = arith.mulf %28, %32 : vector<2x32xf32>
    %cst_15 = arith.constant dense<0.000000e+00> : vector<2x128xf32>
    %34 = tpu.matmul %33, %1, %cst_15 {dimension_numbers = #tpu.dot_dimension_numbers<[1], [0], [0], [1], [0, 0, 1, 1], [], []>} : vector<2x32xf32>, vector<32x128xf32>, vector<2x128xf32> -> vector<2x128xf32>
    %cst_16 = arith.constant dense<0.000000e+00> : vector<2x128xf32>
    %35 = tpu.matmul %12, %2, %cst_16 {dimension_numbers = #tpu.dot_dimension_numbers<[1], [0], [0], [1], [0, 0, 1, 1], [], []>} : vector<2x32xf32>, vector<32x128xf32>, vector<2x128xf32> -> vector<2x128xf32>
    %36 = arith.addf %34, %35 : vector<2x128xf32>
    %37 = arith.addf %36, %11 : vector<2x128xf32>
    %38 = arith.negf %37 : vector<2x128xf32>
    %39 = math.exp %38 : vector<2x128xf32>
    %cst_17 = arith.constant 1.000000e+00 : f32
    %40 = vector.broadcast %cst_17 : f32 to vector<2x128xf32>
    %41 = arith.addf %40, %39 : vector<2x128xf32>
    %42 = arith.divf %40, %41 : vector<2x128xf32>
    %43 = math.tanh %37 : vector<2x128xf32>
    %44 = vector.extract_strided_slice %42 {offsets = [0, 0], sizes = [2, 32], strides = [1, 1]} : vector<2x128xf32> to vector<2x32xf32>
    %45 = vector.extract_strided_slice %42 {offsets = [0, 32], sizes = [2, 32], strides = [1, 1]} : vector<2x128xf32> to vector<2x32xf32>
    %46 = vector.extract_strided_slice %43 {offsets = [0, 64], sizes = [2, 32], strides = [1, 1]} : vector<2x128xf32> to vector<2x32xf32>
    %47 = vector.extract_strided_slice %42 {offsets = [0, 96], sizes = [2, 32], strides = [1, 1]} : vector<2x128xf32> to vector<2x32xf32>
    %48 = arith.mulf %45, %12 : vector<2x32xf32>
    %49 = arith.mulf %44, %46 : vector<2x32xf32>
    %50 = arith.addf %48, %49 : vector<2x32xf32>
    %51 = math.tanh %50 : vector<2x32xf32>
    %52 = arith.mulf %47, %51 : vector<2x32xf32>
    %c0_18 = arith.constant 0 : index
    %c1 = arith.constant 1 : index
    %53 = vector.load %arg1[%c0_18, %c1] : memref<2x8xf32, #tpu.memory_space<vmem>>, vector<2x1xf32>
    %54 = vector.broadcast %53 : vector<2x1xf32> to vector<2x128xf32>
    %55 = arith.mulf %54, %5 : vector<2x128xf32>
    %56 = arith.addf %55, %8 : vector<2x128xf32>
    %cst_19 = arith.constant dense<0.000000e+00> : vector<2x128xf32>
    %57 = tpu.matmul %33, %0, %cst_19 {dimension_numbers = #tpu.dot_dimension_numbers<[1], [0], [0], [1], [0, 0, 1, 1], [], []>} : vector<2x32xf32>, vector<32x128xf32>, vector<2x128xf32> -> vector<2x128xf32>
    %58 = arith.addf %56, %57 : vector<2x128xf32>
    %59 = arith.negf %58 : vector<2x128xf32>
    %60 = math.exp %59 : vector<2x128xf32>
    %cst_20 = arith.constant 1.000000e+00 : f32
    %61 = vector.broadcast %cst_20 : f32 to vector<2x128xf32>
    %62 = arith.addf %61, %60 : vector<2x128xf32>
    %63 = arith.divf %61, %62 : vector<2x128xf32>
    %64 = math.tanh %58 : vector<2x128xf32>
    %65 = vector.extract_strided_slice %63 {offsets = [0, 0], sizes = [2, 32], strides = [1, 1]} : vector<2x128xf32> to vector<2x32xf32>
    %66 = vector.extract_strided_slice %63 {offsets = [0, 32], sizes = [2, 32], strides = [1, 1]} : vector<2x128xf32> to vector<2x32xf32>
    %67 = vector.extract_strided_slice %64 {offsets = [0, 64], sizes = [2, 32], strides = [1, 1]} : vector<2x128xf32> to vector<2x32xf32>
    %68 = vector.extract_strided_slice %63 {offsets = [0, 96], sizes = [2, 32], strides = [1, 1]} : vector<2x128xf32> to vector<2x32xf32>
    %69 = arith.mulf %66, %31 : vector<2x32xf32>
    %70 = arith.mulf %65, %67 : vector<2x32xf32>
    %71 = arith.addf %69, %70 : vector<2x32xf32>
    %72 = math.tanh %71 : vector<2x32xf32>
    %73 = arith.mulf %68, %72 : vector<2x32xf32>
    %cst_21 = arith.constant dense<0.000000e+00> : vector<2x128xf32>
    %74 = tpu.matmul %73, %1, %cst_21 {dimension_numbers = #tpu.dot_dimension_numbers<[1], [0], [0], [1], [0, 0, 1, 1], [], []>} : vector<2x32xf32>, vector<32x128xf32>, vector<2x128xf32> -> vector<2x128xf32>
    %cst_22 = arith.constant dense<0.000000e+00> : vector<2x128xf32>
    %75 = tpu.matmul %52, %2, %cst_22 {dimension_numbers = #tpu.dot_dimension_numbers<[1], [0], [0], [1], [0, 0, 1, 1], [], []>} : vector<2x32xf32>, vector<32x128xf32>, vector<2x128xf32> -> vector<2x128xf32>
    %76 = arith.addf %74, %75 : vector<2x128xf32>
    %77 = arith.addf %76, %11 : vector<2x128xf32>
    %78 = arith.negf %77 : vector<2x128xf32>
    %79 = math.exp %78 : vector<2x128xf32>
    %cst_23 = arith.constant 1.000000e+00 : f32
    %80 = vector.broadcast %cst_23 : f32 to vector<2x128xf32>
    %81 = arith.addf %80, %79 : vector<2x128xf32>
    %82 = arith.divf %80, %81 : vector<2x128xf32>
    %83 = math.tanh %77 : vector<2x128xf32>
    %84 = vector.extract_strided_slice %82 {offsets = [0, 0], sizes = [2, 32], strides = [1, 1]} : vector<2x128xf32> to vector<2x32xf32>
    %85 = vector.extract_strided_slice %82 {offsets = [0, 32], sizes = [2, 32], strides = [1, 1]} : vector<2x128xf32> to vector<2x32xf32>
    %86 = vector.extract_strided_slice %83 {offsets = [0, 64], sizes = [2, 32], strides = [1, 1]} : vector<2x128xf32> to vector<2x32xf32>
    %87 = vector.extract_strided_slice %82 {offsets = [0, 96], sizes = [2, 32], strides = [1, 1]} : vector<2x128xf32> to vector<2x32xf32>
    %88 = arith.mulf %85, %50 : vector<2x32xf32>
    %89 = arith.mulf %84, %86 : vector<2x32xf32>
    %90 = arith.addf %88, %89 : vector<2x32xf32>
    %91 = math.tanh %90 : vector<2x32xf32>
    %92 = arith.mulf %87, %91 : vector<2x32xf32>
    %c0_24 = arith.constant 0 : index
    %c2 = arith.constant 2 : index
    %93 = vector.load %arg1[%c0_24, %c2] : memref<2x8xf32, #tpu.memory_space<vmem>>, vector<2x1xf32>
    %94 = vector.broadcast %93 : vector<2x1xf32> to vector<2x128xf32>
    %95 = arith.mulf %94, %5 : vector<2x128xf32>
    %96 = arith.addf %95, %8 : vector<2x128xf32>
    %cst_25 = arith.constant dense<0.000000e+00> : vector<2x128xf32>
    %97 = tpu.matmul %73, %0, %cst_25 {dimension_numbers = #tpu.dot_dimension_numbers<[1], [0], [0], [1], [0, 0, 1, 1], [], []>} : vector<2x32xf32>, vector<32x128xf32>, vector<2x128xf32> -> vector<2x128xf32>
    %98 = arith.addf %96, %97 : vector<2x128xf32>
    %99 = arith.negf %98 : vector<2x128xf32>
    %100 = math.exp %99 : vector<2x128xf32>
    %cst_26 = arith.constant 1.000000e+00 : f32
    %101 = vector.broadcast %cst_26 : f32 to vector<2x128xf32>
    %102 = arith.addf %101, %100 : vector<2x128xf32>
    %103 = arith.divf %101, %102 : vector<2x128xf32>
    %104 = math.tanh %98 : vector<2x128xf32>
    %105 = vector.extract_strided_slice %103 {offsets = [0, 0], sizes = [2, 32], strides = [1, 1]} : vector<2x128xf32> to vector<2x32xf32>
    %106 = vector.extract_strided_slice %103 {offsets = [0, 32], sizes = [2, 32], strides = [1, 1]} : vector<2x128xf32> to vector<2x32xf32>
    %107 = vector.extract_strided_slice %104 {offsets = [0, 64], sizes = [2, 32], strides = [1, 1]} : vector<2x128xf32> to vector<2x32xf32>
    %108 = vector.extract_strided_slice %103 {offsets = [0, 96], sizes = [2, 32], strides = [1, 1]} : vector<2x128xf32> to vector<2x32xf32>
    %109 = arith.mulf %106, %71 : vector<2x32xf32>
    %110 = arith.mulf %105, %107 : vector<2x32xf32>
    %111 = arith.addf %109, %110 : vector<2x32xf32>
    %112 = math.tanh %111 : vector<2x32xf32>
    %113 = arith.mulf %108, %112 : vector<2x32xf32>
    %cst_27 = arith.constant dense<0.000000e+00> : vector<2x128xf32>
    %114 = tpu.matmul %113, %1, %cst_27 {dimension_numbers = #tpu.dot_dimension_numbers<[1], [0], [0], [1], [0, 0, 1, 1], [], []>} : vector<2x32xf32>, vector<32x128xf32>, vector<2x128xf32> -> vector<2x128xf32>
    %cst_28 = arith.constant dense<0.000000e+00> : vector<2x128xf32>
    %115 = tpu.matmul %92, %2, %cst_28 {dimension_numbers = #tpu.dot_dimension_numbers<[1], [0], [0], [1], [0, 0, 1, 1], [], []>} : vector<2x32xf32>, vector<32x128xf32>, vector<2x128xf32> -> vector<2x128xf32>
    %116 = arith.addf %114, %115 : vector<2x128xf32>
    %117 = arith.addf %116, %11 : vector<2x128xf32>
    %118 = arith.negf %117 : vector<2x128xf32>
    %119 = math.exp %118 : vector<2x128xf32>
    %cst_29 = arith.constant 1.000000e+00 : f32
    %120 = vector.broadcast %cst_29 : f32 to vector<2x128xf32>
    %121 = arith.addf %120, %119 : vector<2x128xf32>
    %122 = arith.divf %120, %121 : vector<2x128xf32>
    %123 = math.tanh %117 : vector<2x128xf32>
    %124 = vector.extract_strided_slice %122 {offsets = [0, 0], sizes = [2, 32], strides = [1, 1]} : vector<2x128xf32> to vector<2x32xf32>
    %125 = vector.extract_strided_slice %122 {offsets = [0, 32], sizes = [2, 32], strides = [1, 1]} : vector<2x128xf32> to vector<2x32xf32>
    %126 = vector.extract_strided_slice %123 {offsets = [0, 64], sizes = [2, 32], strides = [1, 1]} : vector<2x128xf32> to vector<2x32xf32>
    %127 = vector.extract_strided_slice %122 {offsets = [0, 96], sizes = [2, 32], strides = [1, 1]} : vector<2x128xf32> to vector<2x32xf32>
    %128 = arith.mulf %125, %90 : vector<2x32xf32>
    %129 = arith.mulf %124, %126 : vector<2x32xf32>
    %130 = arith.addf %128, %129 : vector<2x32xf32>
    %131 = math.tanh %130 : vector<2x32xf32>
    %132 = arith.mulf %127, %131 : vector<2x32xf32>
    %c0_30 = arith.constant 0 : index
    %c3 = arith.constant 3 : index
    %133 = vector.load %arg1[%c0_30, %c3] : memref<2x8xf32, #tpu.memory_space<vmem>>, vector<2x1xf32>
    %134 = vector.broadcast %133 : vector<2x1xf32> to vector<2x128xf32>
    %135 = arith.mulf %134, %5 : vector<2x128xf32>
    %136 = arith.addf %135, %8 : vector<2x128xf32>
    %cst_31 = arith.constant dense<0.000000e+00> : vector<2x128xf32>
    %137 = tpu.matmul %113, %0, %cst_31 {dimension_numbers = #tpu.dot_dimension_numbers<[1], [0], [0], [1], [0, 0, 1, 1], [], []>} : vector<2x32xf32>, vector<32x128xf32>, vector<2x128xf32> -> vector<2x128xf32>
    %138 = arith.addf %136, %137 : vector<2x128xf32>
    %139 = arith.negf %138 : vector<2x128xf32>
    %140 = math.exp %139 : vector<2x128xf32>
    %cst_32 = arith.constant 1.000000e+00 : f32
    %141 = vector.broadcast %cst_32 : f32 to vector<2x128xf32>
    %142 = arith.addf %141, %140 : vector<2x128xf32>
    %143 = arith.divf %141, %142 : vector<2x128xf32>
    %144 = math.tanh %138 : vector<2x128xf32>
    %145 = vector.extract_strided_slice %143 {offsets = [0, 0], sizes = [2, 32], strides = [1, 1]} : vector<2x128xf32> to vector<2x32xf32>
    %146 = vector.extract_strided_slice %143 {offsets = [0, 32], sizes = [2, 32], strides = [1, 1]} : vector<2x128xf32> to vector<2x32xf32>
    %147 = vector.extract_strided_slice %144 {offsets = [0, 64], sizes = [2, 32], strides = [1, 1]} : vector<2x128xf32> to vector<2x32xf32>
    %148 = vector.extract_strided_slice %143 {offsets = [0, 96], sizes = [2, 32], strides = [1, 1]} : vector<2x128xf32> to vector<2x32xf32>
    %149 = arith.mulf %146, %111 : vector<2x32xf32>
    %150 = arith.mulf %145, %147 : vector<2x32xf32>
    %151 = arith.addf %149, %150 : vector<2x32xf32>
    %152 = math.tanh %151 : vector<2x32xf32>
    %153 = arith.mulf %148, %152 : vector<2x32xf32>
    %cst_33 = arith.constant dense<0.000000e+00> : vector<2x128xf32>
    %154 = tpu.matmul %153, %1, %cst_33 {dimension_numbers = #tpu.dot_dimension_numbers<[1], [0], [0], [1], [0, 0, 1, 1], [], []>} : vector<2x32xf32>, vector<32x128xf32>, vector<2x128xf32> -> vector<2x128xf32>
    %cst_34 = arith.constant dense<0.000000e+00> : vector<2x128xf32>
    %155 = tpu.matmul %132, %2, %cst_34 {dimension_numbers = #tpu.dot_dimension_numbers<[1], [0], [0], [1], [0, 0, 1, 1], [], []>} : vector<2x32xf32>, vector<32x128xf32>, vector<2x128xf32> -> vector<2x128xf32>
    %156 = arith.addf %154, %155 : vector<2x128xf32>
    %157 = arith.addf %156, %11 : vector<2x128xf32>
    %158 = arith.negf %157 : vector<2x128xf32>
    %159 = math.exp %158 : vector<2x128xf32>
    %cst_35 = arith.constant 1.000000e+00 : f32
    %160 = vector.broadcast %cst_35 : f32 to vector<2x128xf32>
    %161 = arith.addf %160, %159 : vector<2x128xf32>
    %162 = arith.divf %160, %161 : vector<2x128xf32>
    %163 = math.tanh %157 : vector<2x128xf32>
    %164 = vector.extract_strided_slice %162 {offsets = [0, 0], sizes = [2, 32], strides = [1, 1]} : vector<2x128xf32> to vector<2x32xf32>
    %165 = vector.extract_strided_slice %162 {offsets = [0, 32], sizes = [2, 32], strides = [1, 1]} : vector<2x128xf32> to vector<2x32xf32>
    %166 = vector.extract_strided_slice %163 {offsets = [0, 64], sizes = [2, 32], strides = [1, 1]} : vector<2x128xf32> to vector<2x32xf32>
    %167 = vector.extract_strided_slice %162 {offsets = [0, 96], sizes = [2, 32], strides = [1, 1]} : vector<2x128xf32> to vector<2x32xf32>
    %168 = arith.mulf %165, %130 : vector<2x32xf32>
    %169 = arith.mulf %164, %166 : vector<2x32xf32>
    %170 = arith.addf %168, %169 : vector<2x32xf32>
    %171 = math.tanh %170 : vector<2x32xf32>
    %172 = arith.mulf %167, %171 : vector<2x32xf32>
    %c0_36 = arith.constant 0 : index
    %c4 = arith.constant 4 : index
    %173 = vector.load %arg1[%c0_36, %c4] : memref<2x8xf32, #tpu.memory_space<vmem>>, vector<2x1xf32>
    %174 = vector.broadcast %173 : vector<2x1xf32> to vector<2x128xf32>
    %175 = arith.mulf %174, %5 : vector<2x128xf32>
    %176 = arith.addf %175, %8 : vector<2x128xf32>
    %cst_37 = arith.constant dense<0.000000e+00> : vector<2x128xf32>
    %177 = tpu.matmul %153, %0, %cst_37 {dimension_numbers = #tpu.dot_dimension_numbers<[1], [0], [0], [1], [0, 0, 1, 1], [], []>} : vector<2x32xf32>, vector<32x128xf32>, vector<2x128xf32> -> vector<2x128xf32>
    %178 = arith.addf %176, %177 : vector<2x128xf32>
    %179 = arith.negf %178 : vector<2x128xf32>
    %180 = math.exp %179 : vector<2x128xf32>
    %cst_38 = arith.constant 1.000000e+00 : f32
    %181 = vector.broadcast %cst_38 : f32 to vector<2x128xf32>
    %182 = arith.addf %181, %180 : vector<2x128xf32>
    %183 = arith.divf %181, %182 : vector<2x128xf32>
    %184 = math.tanh %178 : vector<2x128xf32>
    %185 = vector.extract_strided_slice %183 {offsets = [0, 0], sizes = [2, 32], strides = [1, 1]} : vector<2x128xf32> to vector<2x32xf32>
    %186 = vector.extract_strided_slice %183 {offsets = [0, 32], sizes = [2, 32], strides = [1, 1]} : vector<2x128xf32> to vector<2x32xf32>
    %187 = vector.extract_strided_slice %184 {offsets = [0, 64], sizes = [2, 32], strides = [1, 1]} : vector<2x128xf32> to vector<2x32xf32>
    %188 = vector.extract_strided_slice %183 {offsets = [0, 96], sizes = [2, 32], strides = [1, 1]} : vector<2x128xf32> to vector<2x32xf32>
    %189 = arith.mulf %186, %151 : vector<2x32xf32>
    %190 = arith.mulf %185, %187 : vector<2x32xf32>
    %191 = arith.addf %189, %190 : vector<2x32xf32>
    %192 = math.tanh %191 : vector<2x32xf32>
    %193 = arith.mulf %188, %192 : vector<2x32xf32>
    %cst_39 = arith.constant dense<0.000000e+00> : vector<2x128xf32>
    %194 = tpu.matmul %193, %1, %cst_39 {dimension_numbers = #tpu.dot_dimension_numbers<[1], [0], [0], [1], [0, 0, 1, 1], [], []>} : vector<2x32xf32>, vector<32x128xf32>, vector<2x128xf32> -> vector<2x128xf32>
    %cst_40 = arith.constant dense<0.000000e+00> : vector<2x128xf32>
    %195 = tpu.matmul %172, %2, %cst_40 {dimension_numbers = #tpu.dot_dimension_numbers<[1], [0], [0], [1], [0, 0, 1, 1], [], []>} : vector<2x32xf32>, vector<32x128xf32>, vector<2x128xf32> -> vector<2x128xf32>
    %196 = arith.addf %194, %195 : vector<2x128xf32>
    %197 = arith.addf %196, %11 : vector<2x128xf32>
    %198 = arith.negf %197 : vector<2x128xf32>
    %199 = math.exp %198 : vector<2x128xf32>
    %cst_41 = arith.constant 1.000000e+00 : f32
    %200 = vector.broadcast %cst_41 : f32 to vector<2x128xf32>
    %201 = arith.addf %200, %199 : vector<2x128xf32>
    %202 = arith.divf %200, %201 : vector<2x128xf32>
    %203 = math.tanh %197 : vector<2x128xf32>
    %204 = vector.extract_strided_slice %202 {offsets = [0, 0], sizes = [2, 32], strides = [1, 1]} : vector<2x128xf32> to vector<2x32xf32>
    %205 = vector.extract_strided_slice %202 {offsets = [0, 32], sizes = [2, 32], strides = [1, 1]} : vector<2x128xf32> to vector<2x32xf32>
    %206 = vector.extract_strided_slice %203 {offsets = [0, 64], sizes = [2, 32], strides = [1, 1]} : vector<2x128xf32> to vector<2x32xf32>
    %207 = vector.extract_strided_slice %202 {offsets = [0, 96], sizes = [2, 32], strides = [1, 1]} : vector<2x128xf32> to vector<2x32xf32>
    %208 = arith.mulf %205, %170 : vector<2x32xf32>
    %209 = arith.mulf %204, %206 : vector<2x32xf32>
    %210 = arith.addf %208, %209 : vector<2x32xf32>
    %211 = math.tanh %210 : vector<2x32xf32>
    %212 = arith.mulf %207, %211 : vector<2x32xf32>
    %c0_42 = arith.constant 0 : index
    %c5 = arith.constant 5 : index
    %213 = vector.load %arg1[%c0_42, %c5] : memref<2x8xf32, #tpu.memory_space<vmem>>, vector<2x1xf32>
    %214 = vector.broadcast %213 : vector<2x1xf32> to vector<2x128xf32>
    %215 = arith.mulf %214, %5 : vector<2x128xf32>
    %216 = arith.addf %215, %8 : vector<2x128xf32>
    %cst_43 = arith.constant dense<0.000000e+00> : vector<2x128xf32>
    %217 = tpu.matmul %193, %0, %cst_43 {dimension_numbers = #tpu.dot_dimension_numbers<[1], [0], [0], [1], [0, 0, 1, 1], [], []>} : vector<2x32xf32>, vector<32x128xf32>, vector<2x128xf32> -> vector<2x128xf32>
    %218 = arith.addf %216, %217 : vector<2x128xf32>
    %219 = arith.negf %218 : vector<2x128xf32>
    %220 = math.exp %219 : vector<2x128xf32>
    %cst_44 = arith.constant 1.000000e+00 : f32
    %221 = vector.broadcast %cst_44 : f32 to vector<2x128xf32>
    %222 = arith.addf %221, %220 : vector<2x128xf32>
    %223 = arith.divf %221, %222 : vector<2x128xf32>
    %224 = math.tanh %218 : vector<2x128xf32>
    %225 = vector.extract_strided_slice %223 {offsets = [0, 0], sizes = [2, 32], strides = [1, 1]} : vector<2x128xf32> to vector<2x32xf32>
    %226 = vector.extract_strided_slice %223 {offsets = [0, 32], sizes = [2, 32], strides = [1, 1]} : vector<2x128xf32> to vector<2x32xf32>
    %227 = vector.extract_strided_slice %224 {offsets = [0, 64], sizes = [2, 32], strides = [1, 1]} : vector<2x128xf32> to vector<2x32xf32>
    %228 = vector.extract_strided_slice %223 {offsets = [0, 96], sizes = [2, 32], strides = [1, 1]} : vector<2x128xf32> to vector<2x32xf32>
    %229 = arith.mulf %226, %191 : vector<2x32xf32>
    %230 = arith.mulf %225, %227 : vector<2x32xf32>
    %231 = arith.addf %229, %230 : vector<2x32xf32>
    %232 = math.tanh %231 : vector<2x32xf32>
    %233 = arith.mulf %228, %232 : vector<2x32xf32>
    %cst_45 = arith.constant dense<0.000000e+00> : vector<2x128xf32>
    %234 = tpu.matmul %233, %1, %cst_45 {dimension_numbers = #tpu.dot_dimension_numbers<[1], [0], [0], [1], [0, 0, 1, 1], [], []>} : vector<2x32xf32>, vector<32x128xf32>, vector<2x128xf32> -> vector<2x128xf32>
    %cst_46 = arith.constant dense<0.000000e+00> : vector<2x128xf32>
    %235 = tpu.matmul %212, %2, %cst_46 {dimension_numbers = #tpu.dot_dimension_numbers<[1], [0], [0], [1], [0, 0, 1, 1], [], []>} : vector<2x32xf32>, vector<32x128xf32>, vector<2x128xf32> -> vector<2x128xf32>
    %236 = arith.addf %234, %235 : vector<2x128xf32>
    %237 = arith.addf %236, %11 : vector<2x128xf32>
    %238 = arith.negf %237 : vector<2x128xf32>
    %239 = math.exp %238 : vector<2x128xf32>
    %cst_47 = arith.constant 1.000000e+00 : f32
    %240 = vector.broadcast %cst_47 : f32 to vector<2x128xf32>
    %241 = arith.addf %240, %239 : vector<2x128xf32>
    %242 = arith.divf %240, %241 : vector<2x128xf32>
    %243 = math.tanh %237 : vector<2x128xf32>
    %244 = vector.extract_strided_slice %242 {offsets = [0, 0], sizes = [2, 32], strides = [1, 1]} : vector<2x128xf32> to vector<2x32xf32>
    %245 = vector.extract_strided_slice %242 {offsets = [0, 32], sizes = [2, 32], strides = [1, 1]} : vector<2x128xf32> to vector<2x32xf32>
    %246 = vector.extract_strided_slice %243 {offsets = [0, 64], sizes = [2, 32], strides = [1, 1]} : vector<2x128xf32> to vector<2x32xf32>
    %247 = vector.extract_strided_slice %242 {offsets = [0, 96], sizes = [2, 32], strides = [1, 1]} : vector<2x128xf32> to vector<2x32xf32>
    %248 = arith.mulf %245, %210 : vector<2x32xf32>
    %249 = arith.mulf %244, %246 : vector<2x32xf32>
    %250 = arith.addf %248, %249 : vector<2x32xf32>
    %251 = math.tanh %250 : vector<2x32xf32>
    %252 = arith.mulf %247, %251 : vector<2x32xf32>
    %c0_48 = arith.constant 0 : index
    %c6 = arith.constant 6 : index
    %253 = vector.load %arg1[%c0_48, %c6] : memref<2x8xf32, #tpu.memory_space<vmem>>, vector<2x1xf32>
    %254 = vector.broadcast %253 : vector<2x1xf32> to vector<2x128xf32>
    %255 = arith.mulf %254, %5 : vector<2x128xf32>
    %256 = arith.addf %255, %8 : vector<2x128xf32>
    %cst_49 = arith.constant dense<0.000000e+00> : vector<2x128xf32>
    %257 = tpu.matmul %233, %0, %cst_49 {dimension_numbers = #tpu.dot_dimension_numbers<[1], [0], [0], [1], [0, 0, 1, 1], [], []>} : vector<2x32xf32>, vector<32x128xf32>, vector<2x128xf32> -> vector<2x128xf32>
    %258 = arith.addf %256, %257 : vector<2x128xf32>
    %259 = arith.negf %258 : vector<2x128xf32>
    %260 = math.exp %259 : vector<2x128xf32>
    %cst_50 = arith.constant 1.000000e+00 : f32
    %261 = vector.broadcast %cst_50 : f32 to vector<2x128xf32>
    %262 = arith.addf %261, %260 : vector<2x128xf32>
    %263 = arith.divf %261, %262 : vector<2x128xf32>
    %264 = math.tanh %258 : vector<2x128xf32>
    %265 = vector.extract_strided_slice %263 {offsets = [0, 0], sizes = [2, 32], strides = [1, 1]} : vector<2x128xf32> to vector<2x32xf32>
    %266 = vector.extract_strided_slice %263 {offsets = [0, 32], sizes = [2, 32], strides = [1, 1]} : vector<2x128xf32> to vector<2x32xf32>
    %267 = vector.extract_strided_slice %264 {offsets = [0, 64], sizes = [2, 32], strides = [1, 1]} : vector<2x128xf32> to vector<2x32xf32>
    %268 = vector.extract_strided_slice %263 {offsets = [0, 96], sizes = [2, 32], strides = [1, 1]} : vector<2x128xf32> to vector<2x32xf32>
    %269 = arith.mulf %266, %231 : vector<2x32xf32>
    %270 = arith.mulf %265, %267 : vector<2x32xf32>
    %271 = arith.addf %269, %270 : vector<2x32xf32>
    %272 = math.tanh %271 : vector<2x32xf32>
    %273 = arith.mulf %268, %272 : vector<2x32xf32>
    %cst_51 = arith.constant dense<0.000000e+00> : vector<2x128xf32>
    %274 = tpu.matmul %273, %1, %cst_51 {dimension_numbers = #tpu.dot_dimension_numbers<[1], [0], [0], [1], [0, 0, 1, 1], [], []>} : vector<2x32xf32>, vector<32x128xf32>, vector<2x128xf32> -> vector<2x128xf32>
    %cst_52 = arith.constant dense<0.000000e+00> : vector<2x128xf32>
    %275 = tpu.matmul %252, %2, %cst_52 {dimension_numbers = #tpu.dot_dimension_numbers<[1], [0], [0], [1], [0, 0, 1, 1], [], []>} : vector<2x32xf32>, vector<32x128xf32>, vector<2x128xf32> -> vector<2x128xf32>
    %276 = arith.addf %274, %275 : vector<2x128xf32>
    %277 = arith.addf %276, %11 : vector<2x128xf32>
    %278 = arith.negf %277 : vector<2x128xf32>
    %279 = math.exp %278 : vector<2x128xf32>
    %cst_53 = arith.constant 1.000000e+00 : f32
    %280 = vector.broadcast %cst_53 : f32 to vector<2x128xf32>
    %281 = arith.addf %280, %279 : vector<2x128xf32>
    %282 = arith.divf %280, %281 : vector<2x128xf32>
    %283 = math.tanh %277 : vector<2x128xf32>
    %284 = vector.extract_strided_slice %282 {offsets = [0, 0], sizes = [2, 32], strides = [1, 1]} : vector<2x128xf32> to vector<2x32xf32>
    %285 = vector.extract_strided_slice %282 {offsets = [0, 32], sizes = [2, 32], strides = [1, 1]} : vector<2x128xf32> to vector<2x32xf32>
    %286 = vector.extract_strided_slice %283 {offsets = [0, 64], sizes = [2, 32], strides = [1, 1]} : vector<2x128xf32> to vector<2x32xf32>
    %287 = vector.extract_strided_slice %282 {offsets = [0, 96], sizes = [2, 32], strides = [1, 1]} : vector<2x128xf32> to vector<2x32xf32>
    %288 = arith.mulf %285, %250 : vector<2x32xf32>
    %289 = arith.mulf %284, %286 : vector<2x32xf32>
    %290 = arith.addf %288, %289 : vector<2x32xf32>
    %291 = math.tanh %290 : vector<2x32xf32>
    %292 = arith.mulf %287, %291 : vector<2x32xf32>
    %c0_54 = arith.constant 0 : index
    %c7 = arith.constant 7 : index
    %293 = vector.load %arg1[%c0_54, %c7] : memref<2x8xf32, #tpu.memory_space<vmem>>, vector<2x1xf32>
    %294 = vector.broadcast %293 : vector<2x1xf32> to vector<2x128xf32>
    %295 = arith.mulf %294, %5 : vector<2x128xf32>
    %296 = arith.addf %295, %8 : vector<2x128xf32>
    %cst_55 = arith.constant dense<0.000000e+00> : vector<2x128xf32>
    %297 = tpu.matmul %273, %0, %cst_55 {dimension_numbers = #tpu.dot_dimension_numbers<[1], [0], [0], [1], [0, 0, 1, 1], [], []>} : vector<2x32xf32>, vector<32x128xf32>, vector<2x128xf32> -> vector<2x128xf32>
    %298 = arith.addf %296, %297 : vector<2x128xf32>
    %299 = arith.negf %298 : vector<2x128xf32>
    %300 = math.exp %299 : vector<2x128xf32>
    %cst_56 = arith.constant 1.000000e+00 : f32
    %301 = vector.broadcast %cst_56 : f32 to vector<2x128xf32>
    %302 = arith.addf %301, %300 : vector<2x128xf32>
    %303 = arith.divf %301, %302 : vector<2x128xf32>
    %304 = math.tanh %298 : vector<2x128xf32>
    %305 = vector.extract_strided_slice %303 {offsets = [0, 0], sizes = [2, 32], strides = [1, 1]} : vector<2x128xf32> to vector<2x32xf32>
    %306 = vector.extract_strided_slice %303 {offsets = [0, 32], sizes = [2, 32], strides = [1, 1]} : vector<2x128xf32> to vector<2x32xf32>
    %307 = vector.extract_strided_slice %304 {offsets = [0, 64], sizes = [2, 32], strides = [1, 1]} : vector<2x128xf32> to vector<2x32xf32>
    %308 = vector.extract_strided_slice %303 {offsets = [0, 96], sizes = [2, 32], strides = [1, 1]} : vector<2x128xf32> to vector<2x32xf32>
    %309 = arith.mulf %306, %271 : vector<2x32xf32>
    %310 = arith.mulf %305, %307 : vector<2x32xf32>
    %311 = arith.addf %309, %310 : vector<2x32xf32>
    %312 = math.tanh %311 : vector<2x32xf32>
    %313 = arith.mulf %308, %312 : vector<2x32xf32>
    %cst_57 = arith.constant dense<0.000000e+00> : vector<2x128xf32>
    %314 = tpu.matmul %313, %1, %cst_57 {dimension_numbers = #tpu.dot_dimension_numbers<[1], [0], [0], [1], [0, 0, 1, 1], [], []>} : vector<2x32xf32>, vector<32x128xf32>, vector<2x128xf32> -> vector<2x128xf32>
    %cst_58 = arith.constant dense<0.000000e+00> : vector<2x128xf32>
    %315 = tpu.matmul %292, %2, %cst_58 {dimension_numbers = #tpu.dot_dimension_numbers<[1], [0], [0], [1], [0, 0, 1, 1], [], []>} : vector<2x32xf32>, vector<32x128xf32>, vector<2x128xf32> -> vector<2x128xf32>
    %316 = arith.addf %314, %315 : vector<2x128xf32>
    %317 = arith.addf %316, %11 : vector<2x128xf32>
    %318 = arith.negf %317 : vector<2x128xf32>
    %319 = math.exp %318 : vector<2x128xf32>
    %cst_59 = arith.constant 1.000000e+00 : f32
    %320 = vector.broadcast %cst_59 : f32 to vector<2x128xf32>
    %321 = arith.addf %320, %319 : vector<2x128xf32>
    %322 = arith.divf %320, %321 : vector<2x128xf32>
    %323 = math.tanh %317 : vector<2x128xf32>
    %324 = vector.extract_strided_slice %322 {offsets = [0, 0], sizes = [2, 32], strides = [1, 1]} : vector<2x128xf32> to vector<2x32xf32>
    %325 = vector.extract_strided_slice %322 {offsets = [0, 32], sizes = [2, 32], strides = [1, 1]} : vector<2x128xf32> to vector<2x32xf32>
    %326 = vector.extract_strided_slice %323 {offsets = [0, 64], sizes = [2, 32], strides = [1, 1]} : vector<2x128xf32> to vector<2x32xf32>
    %327 = vector.extract_strided_slice %322 {offsets = [0, 96], sizes = [2, 32], strides = [1, 1]} : vector<2x128xf32> to vector<2x32xf32>
    %328 = arith.mulf %325, %290 : vector<2x32xf32>
    %329 = arith.mulf %324, %326 : vector<2x32xf32>
    %330 = arith.addf %328, %329 : vector<2x32xf32>
    %331 = math.tanh %330 : vector<2x32xf32>
    %332 = arith.mulf %327, %331 : vector<2x32xf32>
    %c0_60 = arith.constant 0 : index
    %c0_61 = arith.constant 0 : index
    %333 = vector.load %arg8[%c0_60, %c0_61] : memref<32x1xf32, #tpu.memory_space<vmem>>, vector<32x1xf32>
    %cst_62 = arith.constant dense<0.000000e+00> : vector<2x1xf32>
    %334 = tpu.matmul %332, %333, %cst_62 {dimension_numbers = #tpu.dot_dimension_numbers<[1], [0], [0], [1], [0, 0, 1, 1], [], []>} : vector<2x32xf32>, vector<32x1xf32>, vector<2x1xf32> -> vector<2x1xf32>
    %c0_63 = arith.constant 0 : index
    %c0_64 = arith.constant 0 : index
    %335 = vector.load %arg9[%c0_63, %c0_64] : memref<1x1xf32, #tpu.memory_space<vmem>>, vector<1x1xf32>
    %336 = vector.broadcast %335 : vector<1x1xf32> to vector<2x1xf32>
    %337 = arith.addf %334, %336 : vector<2x1xf32>
    %c0_65 = arith.constant 0 : index
    %c0_66 = arith.constant 0 : index
    %338 = vector.load %arg10[%c0_65, %c0_66] : memref<2x1xf32, #tpu.memory_space<vmem>>, vector<2x1xf32>
    tpu.vector_store %arg10[%c0_65, %c0_66], %337 {strides = array<i32>} : memref<2x1xf32, #tpu.memory_space<vmem>>, vector<2x1xf32>,
    return
  }
  func.func @transform_0(%arg0: i32) -> (i32, i32) {
    %c0_i32 = arith.constant 0 : i32
    %c0_i32_0 = arith.constant 0 : i32
    return %arg0, %c0_i32 : i32, i32
  }
  func.func @transform_1(%arg0: i32) -> (i32, i32) {
    %c0_i32 = arith.constant 0 : i32
    %c0_i32_0 = arith.constant 0 : i32
    %c0_i32_1 = arith.constant 0 : i32
    return %c0_i32, %c0_i32_0 : i32, i32
  }
  func.func @transform_2(%arg0: i32) -> (i32, i32) {
    %c0_i32 = arith.constant 0 : i32
    %c0_i32_0 = arith.constant 0 : i32
    %c0_i32_1 = arith.constant 0 : i32
    return %c0_i32, %c0_i32_0 : i32, i32
  }
  func.func @transform_3(%arg0: i32) -> (i32, i32) {
    %c0_i32 = arith.constant 0 : i32
    %c0_i32_0 = arith.constant 0 : i32
    %c0_i32_1 = arith.constant 0 : i32
    return %c0_i32, %c0_i32_0 : i32, i32
  }
  func.func @transform_4(%arg0: i32) -> (i32, i32) {
    %c0_i32 = arith.constant 0 : i32
    %c0_i32_0 = arith.constant 0 : i32
    %c0_i32_1 = arith.constant 0 : i32
    return %c0_i32, %c0_i32_0 : i32, i32
  }
  func.func @transform_5(%arg0: i32) -> (i32, i32) {
    %c0_i32 = arith.constant 0 : i32
    %c0_i32_0 = arith.constant 0 : i32
    %c0_i32_1 = arith.constant 0 : i32
    return %c0_i32, %c0_i32_0 : i32, i32
  }
  func.func @transform_6(%arg0: i32) -> (i32, i32) {
    %c0_i32 = arith.constant 0 : i32
    %c0_i32_0 = arith.constant 0 : i32
    %c0_i32_1 = arith.constant 0 : i32
    return %c0_i32, %c0_i32_0 : i32, i32
  }
  func.func @transform_7(%arg0: i32) -> (i32, i32) {
    %c0_i32 = arith.constant 0 : i32
    %c0_i32_0 = arith.constant 0 : i32
    %c0_i32_1 = arith.constant 0 : i32
    return %c0_i32, %c0_i32_0 : i32, i32
  }
  func.func @transform_8(%arg0: i32) -> (i32, i32) {
    %c0_i32 = arith.constant 0 : i32
    %c0_i32_0 = arith.constant 0 : i32
    %c0_i32_1 = arith.constant 0 : i32
    return %c0_i32, %c0_i32_0 : i32, i32
  }
  func.func @transform_9(%arg0: i32) -> (i32, i32) {
    %c0_i32 = arith.constant 0 : i32
    %c0_i32_0 = arith.constant 0 : i32
    return %arg0, %c0_i32 : i32, i32
  }
}

</mosaic_0001>

<bundles_post_ra>
// kernel: lstm_predictor.1
= control target key start
LH: loop header
LB: loop body
LE: loop exit
PB: predicated region body
PF: predicated region fallthrough
CT: control target
= control target key end

     0   :  { %s3646_s0 = inlined_call_operand.vmem [shape: f32[2,8], index: 0, kind: input, shape index: {}]   ;;  %s3647_s1 = inlined_call_operand.vmem [shape: f32[1,128], index: 1, kind: input, shape index: {}]   ;;  %s3648_s2 = inlined_call_operand.vmem [shape: f32[32,128], index: 2, kind: input, shape index: {}]   ;;  %s3649_s3 = inlined_call_operand.vmem [shape: f32[1,128], index: 3, kind: input, shape index: {}]   ;;  %s3650_s4 = inlined_call_operand.hbm [shape: f32[32,128], index: 4, kind: input, shape index: {}]   ;;  %s3651_s5 = inlined_call_operand.hbm [shape: f32[32,128], index: 5, kind: input, shape index: {}]   ;;  %s3652_s6 = inlined_call_operand.vmem [shape: f32[1,128], index: 6, kind: input, shape index: {}]   ;;  %s3653_s7 = inlined_call_operand.vmem [shape: f32[32,1], index: 7, kind: input, shape index: {}]   ;;  %s3654_s8 = inlined_call_operand.<no memory space> [shape: f32[1,1], index: 8, kind: input, shape index: {}]   ;;  %s3655_s9 = inlined_call_operand.vmem [shape: f32[2,1], index: 9, kind: output, shape index: {}]  }
   0x1   :  { %v14_v0 = vstv %s3654_s8 }
   0x2   :  { %15 = vst [vmem:[#allocation2] sm:$0x1] %v14_v0 }
   0x3   :  { %16 = vsyncpa [#allocation4], 0 }
   0x4   :  { %17 = vsyncpa [#allocation6], 0  ;;  %s3053_s11 = smov [#allocation3]  }
   0x5   :  { %s31_s12 = sshll.u32 %s3053_s11, 4  ;;  %s32_s12 = int_to_ptr.vmem [resolvable:$true] %s31_s12 }
   0x6   :  { %s3017_s13 = scalar_lea.vmem %s32_s12, 512  ;;  %p3022_p1 = scmp.lt.s32.totalorder %s32_s12, %s32_s12 }
   0x7   :  { %p3018_p0 = scmp.ne.s32.totalorder %s32_s12, %s3017_s13  ;;  %p3023_p2 = scmp.lt.s32.totalorder %s3017_s13, %s3017_s13 }
   0x9   :  { %p3024_p3 = por %p3023_p2, %p3022_p1 }
   0xb   :  { %p3025_p4 = pnand %p3024_p3, %p3018_p0 }
   0xd   :  { %3028 = shalt.err (!%p3025_p4)
}
   0xe   :  { %s3054_s14 = smov 128   ;;  %s3055_s15 = smov 8  }
   0xf   :  { %37 = dma.hbm_to_vmem [thread:$0]  %s3650_s4, 512, %s32_s12, [#allocation4], %s3054_s14, %s3054_s14, %s3055_s15  }
  0x10   :  { %s3056_s8 = smov [#allocation5]  }
  0x11   :  { %s43_s18 = sshll.u32 %s3056_s8, 4  ;;  %s44_s18 = int_to_ptr.vmem [resolvable:$true] %s43_s18 }
  0x12   :  { %s3037_s19 = scalar_lea.vmem %s44_s18, 512  ;;  %p3042_p6 = scmp.lt.s32.totalorder %s44_s18, %s44_s18 }
  0x13   :  { %p3038_p5 = scmp.ne.s32.totalorder %s44_s18, %s3037_s19  ;;  %p3043_p7 = scmp.lt.s32.totalorder %s3037_s19, %s3037_s19 }
  0x15   :  { %p3044_p8 = por %p3043_p7, %p3042_p6 }
  0x17   :  { %p3045_p9 = pnand %p3044_p8, %p3038_p5 }
  0x19   :  { %3048 = shalt.err (!%p3045_p9)
}
  0x1a   :  { %49 = dma.hbm_to_vmem [thread:$0]  %s3651_s5, 512, %s44_s18, [#allocation6], %s3054_s14, %s3054_s14, %s3055_s15  }
  0x1b   :  { %3049 = dma.done.wait [#allocation4], 512  }
  0x1c   :  { %3050 = vsyncadd [#allocation4], 4294966784 }
  0x1d   :  { %3051 = dma.done.wait [#allocation6], 512  }
  0x1e   :  { %3052 = vsyncadd [#allocation6], 4294966784  ;;  %v3057_v1 = vmov 0.0   ;;  %vm3058_vm0 = vmmov 0   ;;  %v3059_v2 = vmov 0   ;;  %v3137_v3 = vld [vmem:[%s3648_s2 + $0x18] sm:$0xff] }
  0x1f   :  { %2566 = vmatprep.subr.mxu0 %v3057_v1  ;;  %2574 = vmatprep.mubr.msk.f32.mxu0 %vm3058_vm0, %v3057_v1  ;;  %v3142_v4 = vld [vmem:[%s3648_s2 + $0x10] sm:$0xff]  ;;  %v3148_v5 = vld [vmem:[%s3646_s0] sm:$0x3]  ;;  %v3154_v6 = vld [vmem:[%s3648_s2 + $0x8] sm:$0xff]  ;;  %s3060_s13 = smov 64   ;;  %s3061_s14 = smov 32  }
  0x20   :  { %2857 = vset.pattern.permute.xlu0 %v3059_v2  ;;  %2577 = vmatprep.subr.mxu1 %v3057_v1  ;;  %v3162_v7 = vld [vmem:[%s3648_s2] sm:$0xff]  ;;  %v3190_v27 = vld [vmem:[#allocation5 + $0x10] sm:$0xff]  ;;  %v3198_v30 = vld [vmem:[#allocation5 + $0x8] sm:$0xff]  ;;  %v3062_v35 = vmov 1   ;;  %vm103_vm1 = vcmask 261120   ;;  %vm2390_vm2 = vcmask 1024  }
  0x21   :  { %2585 = vmatprep.mubr.msk.f32.mxu1 %vm3058_vm0, %v3057_v1  ;;  %2567 = vmatpush3.msra.mxu0 %v3137_v3  ;;  %v3174_v9 = vld [vmem:[%s3647_s1] ss:$0 sm:$0xff]  ;;  %v3195_v29 = vld [vmem:[#allocation3 + $0x10] sm:$0xff]  ;;  %v3203_v31 = vld [vmem:[#allocation3 + $0x8] sm:$0xff] }
  0x22   :  { %2568 = vmatprep.subr.mxu0 %v3057_v1  ;;  %98 = vperm.xlu0 %2857, %v3148_v5   ;;  %v3180_v11 = vld [vmem:[%s3649_s3] ss:$0 sm:$0xff]  ;;  %v3206_v32 = vld [vmem:[#allocation5] sm:$0xff] }
  0x23   :  { %2569 = vmatpush3.msra.mxu0 %v3142_v4  ;;  %v3188_v26 = vld [vmem:[#allocation5 + $0x18] sm:$0xff]  ;;  %v3213_v33 = vld [vmem:[#allocation3] sm:$0xff]  ;;  %2858 = vset.pattern.permute.xlu1 %v3062_v35 }
  0x24   :  { %2570 = vmatprep.subr.mxu0 %v3057_v1  ;;  %2578 = vmatpush3.msra.mxu1 %v3188_v26  ;;  %v3193_v28 = vld [vmem:[#allocation3 + $0x18] sm:$0xff] }
  0x25   :  { %2571 = vmatpush3.msra.mxu0 %v3154_v6  ;;  %2579 = vmatprep.subr.mxu1 %v3057_v1  ;;  %v3261_v44 = vld [vmem:[%s3652_s6] ss:$0 sm:$0xff] }
  0x26   :  { %2572 = vmatprep.subr.mxu0 %v3057_v1  ;;  %2580 = vmatpush3.msra.mxu1 %v3190_v27 }
  0x27   :  { %2573 = vmatpush3.msra.mxu0 %v3162_v7  ;;  %2581 = vmatprep.subr.mxu1 %v3057_v1 }
  0x28   :  { %2575 = vmatmul.mubr.f32.vlgmr.msra.gmra.mxu0 %v3057_v1  ;;  %2588 = vmatprep.subr.mxu0 %v3057_v1 }
  0x29   :  { %2596 = vmatprep.mubr.msk.f32.mxu0 %vm3058_vm0, %v3057_v1  ;;  %2589 = vmatpush3.msra.mxu0 %v3193_v28 }
  0x2a   :  { %2590 = vmatprep.subr.mxu0 %v3057_v1  ;;  %2582 = vmatpush3.msra.mxu1 %v3198_v30 }
  0x2b   :  { %2591 = vmatpush3.msra.mxu0 %v3195_v29  ;;  %2583 = vmatprep.subr.mxu1 %v3057_v1 }
  0x2c   :  { %2592 = vmatprep.subr.mxu0 %v3057_v1  ;;  %2584 = vmatpush3.msra.mxu1 %v3206_v32 }
  0x2d   :  { %2593 = vmatpush3.msra.mxu0 %v3203_v31  ;;  %2599 = vmatprep.subr.mxu1 %v3057_v1 }
  0x2e   :  { %2594 = vmatprep.subr.mxu0 %v3057_v1  ;;  %2586 = vmatmul.mubr.f32.vlgmr.msra.gmra.mxu1 %v3057_v1 }
  0x2f   :  { %2600 = vmatpush3.msra.mxu1 %v3137_v3  ;;  %2595 = vmatpush3.msra.mxu0 %v3213_v33 }
  0x30   :  { %2601 = vmatprep.subr.mxu1 %v3057_v1  ;;  %2607 = vmatprep.mubr.msk.f32.mxu1 %vm3058_vm0, %v3057_v1 }
  0x31   :  { %2602 = vmatpush3.msra.mxu1 %v3142_v4  ;;  %2610 = vmatprep.subr.mxu0 %v3057_v1 }
  0x32   :  { %2603 = vmatprep.subr.mxu1 %v3057_v1 }
  0x33   :  { %2604 = vmatpush3.msra.mxu1 %v3154_v6 }
  0x34   :  { %2605 = vmatprep.subr.mxu1 %v3057_v1 }
  0x35   :  { %2606 = vmatpush3.msra.mxu1 %v3162_v7 }
  0x36   :  { %2621 = vmatprep.subr.mxu1 %v3057_v1 }
  0x9d   :  { %v99_v8 = vpop.permute.xlu0 %98 }
  0x9e   :  { %v101_v10 = vmul.f32 %v3174_v9, %v99_v8 }
  0xa0   :  { %v102_v12 = vadd.f32 %v3180_v11, %v101_v10 }
  0xe8   :  { %v173_v13 = vpop.f32.mrf.mxu0 }
  0xe9   :  { %v177_v14 = vadd.f32 %v173_v13, %v102_v12 }
  0xea   :  { %v2576_v15 = vpop.f32.mrf.mxu0 }
  0xeb   :  { %2865 = vtanh.f32 %v177_v14  ;;  %v2401_v17 = vmul.f32 -1.442695, %v177_v14 }
  0xed   :  { %2867 = vpow2.f32 %v2401_v17 }
  0xee   :  { %v268_v38 = vpop.f32.mrf.mxu1 }
  0xf0   :  { %v2587_v39 = vpop.f32.mrf.mxu1 }
  0xf8   :  { %v2866_v16 = vpop.eup %2865 }
  0xf9   :  { %187 = vrot.lane.b32.xlu0 %v2866_v16, %s3060_s13 }
  0xfa   :  { %v2868_v18 = vpop.eup %2867 }
  0xfb   :  { %v181_v19 = vadd.f32 1.0, %v2868_v18 }
  0xfd   :  { %2869 = vrcp.f32 %v181_v19 }
 0x10a   :  { %v2870_v20 = vpop.eup %2869 }
 0x10b   :  { %v185_v23 = vmul.f32 0.0, %v2870_v20 }
 0x16b   :  { %v188_v21 = vpop.permute.xlu0 %187 }
 0x16c   :  { %v190_v22 = vmul.f32 %v2870_v20, %v188_v21 }
 0x16e   :  { %192 = vrot.lane.b32.xlu1 %v190_v22, %s3061_s14 }
 0x1e0   :  { %v193_v24 = vpop.permute.xlu1 %192 }
 0x1e1   :  { %v3185_v25 = vadd.f32 %v193_v24, %v185_v23 }
 0x1e3   :  { %2871 = vtanh.f32 %v3185_v25 }
 0x1f0   :  { %v2872_v34 = vpop.eup %2871 }
 0x1f1   :  { %198 = vrot.lane.b32.xlu1 %v2872_v34, %s3060_s13 }
 0x1f5   :  { %373 = vperm.xlu1 %2858, %v3148_v5  }
 0x263   :  { %v199_v36 = vpop.permute.xlu1 %198 }
 0x264   :  { %v201_v37 = vmul.f32 %v2870_v20, %v199_v36  ;;  %v3063_v20 = vmov 2  }
 0x265   :  { %2859 = vset.pattern.permute.xlu0 %v3063_v20 }
 0x266   :  { %273 = vrot.lane.b32.xlu0 %v201_v37, %s3061_s14 }
 0x270   :  { %v374_v41 = vpop.permute.xlu1 %373 }
 0x271   :  { %v376_v42 = vmul.f32 %v3174_v9, %v374_v41 }
 0x273   :  { %v377_v43 = vadd.f32 %v3180_v11, %v376_v42 }
 0x2d8   :  { %v274_v40 = vpop.permute.xlu0 %273 }
 0x2d9   :  { %2597 = vmatmul.mubr.msk.f32.vlgmr.msra.gmra.mxu0 %vm103_vm1, %v274_v40  ;;  %2608 = vmatmul.mubr.msk.f32.vlgmr.msra.gmra.mxu1 %vm103_vm1, %v274_v40 }
 0x2da   :  { %2622 = vmatpush3.msra.mxu1 %v3193_v28  ;;  %2611 = vmatpush3.msra.mxu0 %v3188_v26 }
 0x2db   :  { %2623 = vmatprep.subr.mxu1 %v3057_v1  ;;  %2612 = vmatprep.subr.mxu0 %v3057_v1 }
 0x2dc   :  { %2624 = vmatpush3.msra.mxu1 %v3195_v29  ;;  %2613 = vmatpush3.msra.mxu0 %v3190_v27 }
 0x2dd   :  { %2625 = vmatprep.subr.mxu1 %v3057_v1  ;;  %2614 = vmatprep.subr.mxu0 %v3057_v1 }
 0x2de   :  { %2626 = vmatpush3.msra.mxu1 %v3203_v31  ;;  %2615 = vmatpush3.msra.mxu0 %v3198_v30 }
 0x2df   :  { %2627 = vmatprep.subr.mxu1 %v3057_v1  ;;  %2616 = vmatprep.subr.mxu0 %v3057_v1 }
 0x2e0   :  { %2628 = vmatpush3.msra.mxu1 %v3213_v33  ;;  %2629 = vmatprep.mubr.msk.f32.mxu1 %vm3058_vm0, %v3057_v1 }
 0x2e1   :  { %2617 = vmatpush3.msra.mxu0 %v3206_v32  ;;  %2618 = vmatprep.mubr.msk.f32.mxu0 %vm3058_vm0, %v3057_v1 }
 0x2e2   :  { %2632 = vmatprep.subr.mxu0 %v3057_v1  ;;  %2643 = vmatprep.subr.mxu1 %v3057_v1 }
 0x399   :  { %v343_v45 = vpop.f32.mrf.mxu0  ;;  %v444_v46 = vpop.f32.mrf.mxu1 }
 0x39a   :  { %v344_v47 = vadd.f32 %v343_v45, %v268_v38  ;;  %v448_v48 = vadd.f32 %v444_v46, %v377_v43 }
 0x39b   :  { %v2598_v49 = vpop.f32.mrf.mxu0  ;;  %v2609_v50 = vpop.f32.mrf.mxu1 }
 0x39c   :  { %v347_v51 = vadd.f32 %v3261_v44, %v344_v47  ;;  %2873 = vtanh.f32 %v448_v48  ;;  %v2405_v54 = vmul.f32 -1.442695, %v448_v48 }
 0x39e   :  { %2875 = vtanh.f32 %v347_v51  ;;  %v2403_v55 = vmul.f32 -1.442695, %v347_v51 }
 0x39f   :  { %2877 = vpow2.f32 %v2405_v54 }
 0x3a0   :  { %2879 = vpow2.f32 %v2403_v55 }
 0x3a9   :  { %v2874_v52 = vpop.eup %2873 }
 0x3aa   :  { %458 = vrot.lane.b32.xlu1 %v2874_v52, %s3060_s13 }
 0x3ab   :  { %v2876_v53 = vpop.eup %2875 }
 0x3ac   :  { %357 = vrot.lane.b32.xlu0 %v2876_v53, %s3060_s13  ;;  %v2878_v56 = vpop.eup %2877 }
 0x3ad   :  { %v2880_v57 = vpop.eup %2879  ;;  %v452_v58 = vadd.f32 1.0, %v2878_v56 }
 0x3ae   :  { %v351_v59 = vadd.f32 1.0, %v2880_v57 }
 0x3af   :  { %2881 = vrcp.f32 %v452_v58 }
 0x3b0   :  { %2883 = vrcp.f32 %v351_v59 }
 0x3bc   :  { %v2882_v60 = vpop.eup %2881 }
 0x3bd   :  { %v2884_v63 = vpop.eup %2883  ;;  %v456_v8 = vmul.f32 %v2882_v60, %v3185_v25 }
 0x3be   :  { %v355_v13 = vmul.f32 0.0, %v2884_v63 }
 0x41c   :  { %v459_v61 = vpop.permute.xlu1 %458 }
 0x41d   :  { %v461_v62 = vmul.f32 %v2882_v60, %v459_v61 }
 0x41e   :  { %v358_v0 = vpop.permute.xlu0 %357 }
 0x41f   :  { %v360_v2 = vmul.f32 %v2884_v63, %v358_v0  ;;  %463 = vrot.lane.b32.xlu1 %v461_v62, %s3061_s14 }
 0x421   :  { %362 = vrot.lane.b32.xlu0 %v360_v2, %s3061_s14 }
 0x491   :  { %v464_v10 = vpop.permute.xlu1 %463 }
 0x492   :  { %v3269_v12 = vadd.f32 %v464_v10, %v456_v8 }
 0x493   :  { %v363_v14 = vpop.permute.xlu0 %362 }
 0x494   :  { %2885 = vtanh.f32 %v3269_v12  ;;  %v3272_v15 = vadd.f32 %v363_v14, %v355_v13  ;;  %v3064_v13 = vmov 3  }
 0x496   :  { %2887 = vtanh.f32 %v3272_v15 }
 0x4a1   :  { %v2886_v16 = vpop.eup %2885 }
 0x4a2   :  { %469 = vrot.lane.b32.xlu1 %v2886_v16, %s3060_s13 }
 0x4a3   :  { %v2888_v17 = vpop.eup %2887 }
 0x4a4   :  { %368 = vrot.lane.b32.xlu0 %v2888_v17, %s3060_s13 }
 0x514   :  { %v470_v18 = vpop.permute.xlu1 %469 }
 0x515   :  { %v472_v19 = vmul.f32 %v2882_v60, %v470_v18 }
 0x516   :  { %v369_v21 = vpop.permute.xlu0 %368 }
 0x517   :  { %v371_v22 = vmul.f32 %v2884_v63, %v369_v21  ;;  %549 = vrot.lane.b32.xlu1 %v472_v19, %s3061_s14 }
 0x519   :  { %474 = vrot.lane.b32.xlu0 %v371_v22, %s3061_s14 }
 0x51d   :  { %649 = vperm.xlu0 %2859, %v3148_v5  }
 0x521   :  { %2860 = vset.pattern.permute.xlu0 %v3064_v13 }
 0x589   :  { %v550_v23 = vpop.permute.xlu1 %549 }
 0x58a   :  { %2630 = vmatmul.mubr.msk.f32.vlgmr.msra.gmra.mxu1 %vm103_vm1, %v550_v23 }
 0x58b   :  { %v475_v24 = vpop.permute.xlu0 %474  ;;  %2644 = vmatpush3.msra.mxu1 %v3188_v26  ;;  %2651 = vmatprep.mubr.msk.f32.mxu1 %vm3058_vm0, %v3057_v1 }
 0x58c   :  { %2619 = vmatmul.mubr.msk.f32.vlgmr.msra.gmra.mxu0 %vm103_vm1, %v475_v24  ;;  %2645 = vmatprep.subr.mxu1 %v3057_v1 }
 0x58d   :  { %2633 = vmatpush3.msra.mxu0 %v3137_v3  ;;  %2640 = vmatprep.mubr.msk.f32.mxu0 %vm3058_vm0, %v3057_v1 }
 0x58e   :  { %2634 = vmatprep.subr.mxu0 %v3057_v1  ;;  %2646 = vmatpush3.msra.mxu1 %v3190_v27 }
 0x58f   :  { %2635 = vmatpush3.msra.mxu0 %v3142_v4  ;;  %2647 = vmatprep.subr.mxu1 %v3057_v1 }
 0x590   :  { %2636 = vmatprep.subr.mxu0 %v3057_v1  ;;  %2648 = vmatpush3.msra.mxu1 %v3198_v30 }
 0x591   :  { %2637 = vmatpush3.msra.mxu0 %v3154_v6  ;;  %2649 = vmatprep.subr.mxu1 %v3057_v1 }
 0x592   :  { %2638 = vmatprep.subr.mxu0 %v3057_v1  ;;  %2650 = vmatpush3.msra.mxu1 %v3206_v32 }
 0x593   :  { %2639 = vmatpush3.msra.mxu0 %v3162_v7  ;;  %2665 = vmatprep.subr.mxu1 %v3057_v1 }
 0x594   :  { %2641 = vmatmul.mubr.msk.f32.vlgmr.msra.gmra.mxu0 %vm103_vm1, %v550_v23  ;;  %2654 = vmatprep.subr.mxu0 %v3057_v1 }
 0x595   :  { %2655 = vmatpush3.msra.mxu0 %v3193_v28  ;;  %2662 = vmatprep.mubr.msk.f32.mxu0 %vm3058_vm0, %v3057_v1 }
 0x596   :  { %2656 = vmatprep.subr.mxu0 %v3057_v1 }
 0x597   :  { %2657 = vmatpush3.msra.mxu0 %v3195_v29 }
 0x598   :  { %2658 = vmatprep.subr.mxu0 %v3057_v1  ;;  %v650_v34 = vpop.permute.xlu0 %649 }
 0x599   :  { %2659 = vmatpush3.msra.mxu0 %v3203_v31  ;;  %v652_v38 = vmul.f32 %v3174_v9, %v650_v34 }
 0x59a   :  { %2660 = vmatprep.subr.mxu0 %v3057_v1 }
 0x59b   :  { %2661 = vmatpush3.msra.mxu0 %v3213_v33  ;;  %v653_v41 = vadd.f32 %v3180_v11, %v652_v38 }
 0x59c   :  { %2676 = vmatprep.subr.mxu0 %v3057_v1 }
 0x64a   :  { %v619_v25 = vpop.f32.mrf.mxu1 }
 0x64c   :  { %v544_v35 = vpop.f32.mrf.mxu0  ;;  %v2631_v36 = vpop.f32.mrf.mxu1 }
 0x64d   :  { %v620_v37 = vadd.f32 %v619_v25, %v544_v35 }
 0x64e   :  { %v2620_v39 = vpop.f32.mrf.mxu0 }
 0x64f   :  { %v623_v40 = vadd.f32 %v3261_v44, %v620_v37 }
 0x651   :  { %2889 = vtanh.f32 %v623_v40  ;;  %v2408_v48 = vmul.f32 -1.442695, %v623_v40 }
 0x654   :  { %v720_v42 = vpop.f32.mrf.mxu0 }
 0x655   :  { %v724_v43 = vadd.f32 %v720_v42, %v653_v41 }
 0x656   :  { %v2642_v45 = vpop.f32.mrf.mxu0 }
 0x657   :  { %2891 = vtanh.f32 %v724_v43  ;;  %v2410_v49 = vmul.f32 -1.442695, %v724_v43 }
 0x658   :  { %2893 = vpow2.f32 %v2408_v48 }
 0x659   :  { %2895 = vpow2.f32 %v2410_v49 }
 0x65e   :  { %v2890_v46 = vpop.eup %2889 }
 0x65f   :  { %633 = vrot.lane.b32.xlu1 %v2890_v46, %s3060_s13 }
 0x664   :  { %v2892_v47 = vpop.eup %2891 }
 0x665   :  { %734 = vrot.lane.b32.xlu1 %v2892_v47, %s3060_s13  ;;  %v2894_v50 = vpop.eup %2893 }
 0x666   :  { %v627_v51 = vadd.f32 1.0, %v2894_v50  ;;  %v2896_v52 = vpop.eup %2895 }
 0x667   :  { %v728_v53 = vadd.f32 1.0, %v2896_v52 }
 0x668   :  { %2897 = vrcp.f32 %v627_v51 }
 0x669   :  { %2899 = vrcp.f32 %v728_v53 }
 0x675   :  { %v2898_v54 = vpop.eup %2897 }
 0x676   :  { %v2900_v57 = vpop.eup %2899  ;;  %v631_v60 = vmul.f32 %v2898_v54, %v3272_v15 }
 0x677   :  { %v732_v63 = vmul.f32 %v2900_v57, %v3269_v12 }
 0x6d1   :  { %v634_v55 = vpop.permute.xlu1 %633 }
 0x6d2   :  { %v636_v56 = vmul.f32 %v2898_v54, %v634_v55 }
 0x6d4   :  { %638 = vrot.lane.b32.xlu0 %v636_v56, %s3061_s14 }
 0x6d7   :  { %v735_v58 = vpop.permute.xlu1 %734 }
 0x6d8   :  { %v737_v59 = vmul.f32 %v2900_v57, %v735_v58 }
 0x6da   :  { %739 = vrot.lane.b32.xlu1 %v737_v59, %s3061_s14 }
 0x746   :  { %v639_v61 = vpop.permute.xlu0 %638 }
 0x747   :  { %v3321_v62 = vadd.f32 %v639_v61, %v631_v60 }
 0x749   :  { %2901 = vtanh.f32 %v3321_v62 }
 0x74c   :  { %v740_v0 = vpop.permute.xlu1 %739 }
 0x74d   :  { %v3325_v2 = vadd.f32 %v740_v0, %v732_v63  ;;  %v3065_v63 = vmov 4  }
 0x74f   :  { %2903 = vtanh.f32 %v3325_v2 }
 0x756   :  { %v2902_v8 = vpop.eup %2901 }
 0x757   :  { %644 = vrot.lane.b32.xlu0 %v2902_v8, %s3060_s13 }
 0x75c   :  { %v2904_v10 = vpop.eup %2903 }
 0x75d   :  { %745 = vrot.lane.b32.xlu1 %v2904_v10, %s3060_s13 }
 0x7c9   :  { %v645_v14 = vpop.permute.xlu0 %644 }
 0x7ca   :  { %v647_v15 = vmul.f32 %v2898_v54, %v645_v14 }
 0x7cc   :  { %750 = vrot.lane.b32.xlu0 %v647_v15, %s3061_s14 }
 0x7cf   :  { %v746_v16 = vpop.permute.xlu1 %745 }
 0x7d0   :  { %v748_v17 = vmul.f32 %v2900_v57, %v746_v16  ;;  %925 = vperm.xlu0 %2860, %v3148_v5  }
 0x7d2   :  { %825 = vrot.lane.b32.xlu1 %v748_v17, %s3061_s14 }
 0x7d4   :  { %2861 = vset.pattern.permute.xlu0 %v3065_v63 }
 0x83e   :  { %v751_v12 = vpop.permute.xlu0 %750 }
 0x83f   :  { %2652 = vmatmul.mubr.msk.f32.vlgmr.msra.gmra.mxu1 %vm103_vm1, %v751_v12 }
 0x840   :  { %2666 = vmatpush3.msra.mxu1 %v3137_v3  ;;  %2673 = vmatprep.mubr.msk.f32.mxu1 %vm3058_vm0, %v3057_v1 }
 0x841   :  { %2667 = vmatprep.subr.mxu1 %v3057_v1 }
 0x842   :  { %2668 = vmatpush3.msra.mxu1 %v3142_v4 }
 0x843   :  { %2669 = vmatprep.subr.mxu1 %v3057_v1 }
 0x844   :  { %2670 = vmatpush3.msra.mxu1 %v3154_v6  ;;  %v826_v18 = vpop.permute.xlu1 %825 }
 0x845   :  { %2663 = vmatmul.mubr.msk.f32.vlgmr.msra.gmra.mxu0 %vm103_vm1, %v826_v18  ;;  %2671 = vmatprep.subr.mxu1 %v3057_v1 }
 0x846   :  { %2672 = vmatpush3.msra.mxu1 %v3162_v7  ;;  %2677 = vmatpush3.msra.mxu0 %v3188_v26 }
 0x847   :  { %2674 = vmatmul.mubr.msk.f32.vlgmr.msra.gmra.mxu1 %vm103_vm1, %v826_v18  ;;  %2678 = vmatprep.subr.mxu0 %v3057_v1 }
 0x848   :  { %2679 = vmatpush3.msra.mxu0 %v3190_v27  ;;  %2687 = vmatprep.subr.mxu1 %v3057_v1 }
 0x849   :  { %2680 = vmatprep.subr.mxu0 %v3057_v1  ;;  %2688 = vmatpush3.msra.mxu1 %v3193_v28 }
 0x84a   :  { %2681 = vmatpush3.msra.mxu0 %v3198_v30  ;;  %2689 = vmatprep.subr.mxu1 %v3057_v1 }
 0x84b   :  { %2682 = vmatprep.subr.mxu0 %v3057_v1  ;;  %2684 = vmatprep.mubr.msk.f32.mxu0 %vm3058_vm0, %v3057_v1  ;;  %v926_v20 = vpop.permute.xlu0 %925 }
 0x84c   :  { %2683 = vmatpush3.msra.mxu0 %v3206_v32  ;;  %2690 = vmatpush3.msra.mxu1 %v3195_v29  ;;  %v928_v22 = vmul.f32 %v3174_v9, %v926_v20 }
 0x84d   :  { %2698 = vmatprep.subr.mxu0 %v3057_v1  ;;  %2691 = vmatprep.subr.mxu1 %v3057_v1 }
 0x84e   :  { %2692 = vmatpush3.msra.mxu1 %v3203_v31  ;;  %2695 = vmatprep.mubr.msk.f32.mxu1 %vm3058_vm0, %v3057_v1  ;;  %v929_v25 = vadd.f32 %v3180_v11, %v928_v22 }
 0x84f   :  { %2693 = vmatprep.subr.mxu1 %v3057_v1 }
 0x850   :  { %2694 = vmatpush3.msra.mxu1 %v3213_v33 }
 0x851   :  { %2709 = vmatprep.subr.mxu1 %v3057_v1 }
 0x8ff   :  { %v820_v19 = vpop.f32.mrf.mxu1 }
 0x901   :  { %v2653_v21 = vpop.f32.mrf.mxu1 }
 0x905   :  { %v895_v23 = vpop.f32.mrf.mxu0 }
 0x906   :  { %v896_v24 = vadd.f32 %v895_v23, %v820_v19 }
 0x907   :  { %v2664_v34 = vpop.f32.mrf.mxu0  ;;  %v996_v35 = vpop.f32.mrf.mxu1 }
 0x908   :  { %v899_v36 = vadd.f32 %v3261_v44, %v896_v24  ;;  %v1000_v38 = vadd.f32 %v996_v35, %v929_v25 }
 0x909   :  { %v2675_v37 = vpop.f32.mrf.mxu1 }
 0x90a   :  { %2905 = vtanh.f32 %v899_v36  ;;  %v2413_v41 = vmul.f32 -1.442695, %v899_v36  ;;  %v2415_v42 = vmul.f32 -1.442695, %v1000_v38 }
 0x90b   :  { %2907 = vtanh.f32 %v1000_v38 }
 0x90c   :  { %2909 = vpow2.f32 %v2413_v41 }
 0x90d   :  { %2911 = vpow2.f32 %v2415_v42 }
 0x917   :  { %v2906_v39 = vpop.eup %2905 }
 0x918   :  { %909 = vrot.lane.b32.xlu1 %v2906_v39, %s3060_s13  ;;  %v2908_v40 = vpop.eup %2907 }
 0x919   :  { %v2910_v43 = vpop.eup %2909 }
 0x91a   :  { %v903_v45 = vadd.f32 1.0, %v2910_v43  ;;  %v2912_v46 = vpop.eup %2911 }
 0x91b   :  { %v1004_v47 = vadd.f32 1.0, %v2912_v46 }
 0x91c   :  { %1010 = vrot.lane.b32.xlu1 %v2908_v40, %s3060_s13  ;;  %2913 = vrcp.f32 %v903_v45 }
 0x91d   :  { %2915 = vrcp.f32 %v1004_v47 }
 0x929   :  { %v2914_v48 = vpop.eup %2913 }
 0x92a   :  { %v2916_v51 = vpop.eup %2915  ;;  %v907_v54 = vmul.f32 %v2914_v48, %v3321_v62 }
 0x92b   :  { %v1008_v57 = vmul.f32 %v2916_v51, %v3325_v2 }
 0x98a   :  { %v910_v49 = vpop.permute.xlu1 %909 }
 0x98b   :  { %v912_v50 = vmul.f32 %v2914_v48, %v910_v49 }
 0x98d   :  { %914 = vrot.lane.b32.xlu0 %v912_v50, %s3061_s14 }
 0x98e   :  { %v1011_v52 = vpop.permute.xlu1 %1010 }
 0x98f   :  { %v1013_v53 = vmul.f32 %v2916_v51, %v1011_v52 }
 0x991   :  { %1015 = vrot.lane.b32.xlu1 %v1013_v53, %s3061_s14 }
 0x9ff   :  { %v915_v55 = vpop.permute.xlu0 %914 }
 0xa00   :  { %v3374_v56 = vadd.f32 %v915_v55, %v907_v54 }
 0xa02   :  { %2917 = vtanh.f32 %v3374_v56 }
 0xa03   :  { %v1016_v58 = vpop.permute.xlu1 %1015 }
 0xa04   :  { %v3378_v59 = vadd.f32 %v1016_v58, %v1008_v57  ;;  %v3066_v57 = vmov 5  }
 0xa06   :  { %2919 = vtanh.f32 %v3378_v59 }
 0xa0f   :  { %v2918_v60 = vpop.eup %2917 }
 0xa10   :  { %920 = vrot.lane.b32.xlu0 %v2918_v60, %s3060_s13 }
 0xa13   :  { %v2920_v61 = vpop.eup %2919 }
 0xa14   :  { %1021 = vrot.lane.b32.xlu1 %v2920_v61, %s3060_s13 }
 0xa82   :  { %v921_v62 = vpop.permute.xlu0 %920 }
 0xa83   :  { %v923_v0 = vmul.f32 %v2914_v48, %v921_v62 }
 0xa85   :  { %1026 = vrot.lane.b32.xlu0 %v923_v0, %s3061_s14 }
 0xa86   :  { %v1022_v8 = vpop.permute.xlu1 %1021 }
 0xa87   :  { %v1024_v10 = vmul.f32 %v2916_v51, %v1022_v8 }
 0xa89   :  { %1101 = vrot.lane.b32.xlu1 %v1024_v10, %s3061_s14  ;;  %1201 = vperm.xlu0 %2861, %v3148_v5  }
 0xa8d   :  { %2862 = vset.pattern.permute.xlu0 %v3066_v57 }
 0xaf7   :  { %v1027_v2 = vpop.permute.xlu0 %1026 }
 0xaf8   :  { %2685 = vmatmul.mubr.msk.f32.vlgmr.msra.gmra.mxu0 %vm103_vm1, %v1027_v2 }
 0xaf9   :  { %2699 = vmatpush3.msra.mxu0 %v3137_v3  ;;  %2706 = vmatprep.mubr.msk.f32.mxu0 %vm3058_vm0, %v3057_v1 }
 0xafa   :  { %2700 = vmatprep.subr.mxu0 %v3057_v1 }
 0xafb   :  { %2701 = vmatpush3.msra.mxu0 %v3142_v4  ;;  %v1102_v13 = vpop.permute.xlu1 %1101 }
 0xafc   :  { %2702 = vmatprep.subr.mxu0 %v3057_v1  ;;  %2696 = vmatmul.mubr.msk.f32.vlgmr.msra.gmra.mxu1 %vm103_vm1, %v1102_v13 }
 0xafd   :  { %2703 = vmatpush3.msra.mxu0 %v3154_v6  ;;  %2710 = vmatpush3.msra.mxu1 %v3188_v26 }
 0xafe   :  { %2704 = vmatprep.subr.mxu0 %v3057_v1  ;;  %2711 = vmatprep.subr.mxu1 %v3057_v1 }
 0xaff   :  { %2705 = vmatpush3.msra.mxu0 %v3162_v7  ;;  %2712 = vmatpush3.msra.mxu1 %v3190_v27 }
 0xb00   :  { %2707 = vmatmul.mubr.msk.f32.vlgmr.msra.gmra.mxu0 %vm103_vm1, %v1102_v13  ;;  %2713 = vmatprep.subr.mxu1 %v3057_v1 }
 0xb01   :  { %2714 = vmatpush3.msra.mxu1 %v3198_v30  ;;  %2720 = vmatprep.subr.mxu0 %v3057_v1 }
 0xb02   :  { %2715 = vmatprep.subr.mxu1 %v3057_v1  ;;  %2721 = vmatpush3.msra.mxu0 %v3193_v28 }
 0xb03   :  { %2716 = vmatpush3.msra.mxu1 %v3206_v32  ;;  %2722 = vmatprep.subr.mxu0 %v3057_v1 }
 0xb04   :  { %2717 = vmatprep.mubr.msk.f32.mxu1 %vm3058_vm0, %v3057_v1  ;;  %2723 = vmatpush3.msra.mxu0 %v3195_v29  ;;  %v1202_v14 = vpop.permute.xlu0 %1201 }
 0xb05   :  { %2731 = vmatprep.subr.mxu1 %v3057_v1  ;;  %2724 = vmatprep.subr.mxu0 %v3057_v1  ;;  %v1204_v16 = vmul.f32 %v3174_v9, %v1202_v14 }
 0xb06   :  { %2725 = vmatpush3.msra.mxu0 %v3203_v31  ;;  %2728 = vmatprep.mubr.msk.f32.mxu0 %vm3058_vm0, %v3057_v1 }
 0xb07   :  { %2726 = vmatprep.subr.mxu0 %v3057_v1  ;;  %v1205_v19 = vadd.f32 %v3180_v11, %v1204_v16 }
 0xb08   :  { %2727 = vmatpush3.msra.mxu0 %v3213_v33 }
 0xb09   :  { %2742 = vmatprep.subr.mxu0 %v3057_v1 }
 0xbb8   :  { %v1096_v15 = vpop.f32.mrf.mxu0 }
 0xbba   :  { %v2686_v17 = vpop.f32.mrf.mxu0 }
 0xbbc   :  { %v1171_v12 = vpop.f32.mrf.mxu1 }
 0xbbd   :  { %v1172_v18 = vadd.f32 %v1171_v12, %v1096_v15 }
 0xbbe   :  { %v2697_v20 = vpop.f32.mrf.mxu1 }
 0xbbf   :  { %v1175_v21 = vadd.f32 %v3261_v44, %v1172_v18 }
 0xbc0   :  { %v1272_v22 = vpop.f32.mrf.mxu0 }
 0xbc1   :  { %2921 = vtanh.f32 %v1175_v21  ;;  %v1276_v23 = vadd.f32 %v1272_v22, %v1205_v19  ;;  %v2418_v35 = vmul.f32 -1.442695, %v1175_v21 }
 0xbc2   :  { %v2708_v24 = vpop.f32.mrf.mxu0 }
 0xbc3   :  { %2923 = vtanh.f32 %v1276_v23  ;;  %v2420_v36 = vmul.f32 -1.442695, %v1276_v23 }
 0xbc4   :  { %2925 = vpow2.f32 %v2418_v35 }
 0xbc5   :  { %2927 = vpow2.f32 %v2420_v36 }
 0xbce   :  { %v2922_v25 = vpop.eup %2921 }
 0xbcf   :  { %1185 = vrot.lane.b32.xlu1 %v2922_v25, %s3060_s13 }
 0xbd0   :  { %v2924_v34 = vpop.eup %2923 }
 0xbd1   :  { %v2926_v37 = vpop.eup %2925 }
 0xbd2   :  { %v1179_v38 = vadd.f32 1.0, %v2926_v37  ;;  %v2928_v39 = vpop.eup %2927 }
 0xbd3   :  { %1286 = vrot.lane.b32.xlu1 %v2924_v34, %s3060_s13  ;;  %v1280_v40 = vadd.f32 1.0, %v2928_v39 }
 0xbd4   :  { %2929 = vrcp.f32 %v1179_v38 }
 0xbd5   :  { %2931 = vrcp.f32 %v1280_v40 }
 0xbe1   :  { %v2930_v41 = vpop.eup %2929 }
 0xbe2   :  { %v2932_v45 = vpop.eup %2931  ;;  %v1183_v48 = vmul.f32 %v2930_v41, %v3374_v56 }
 0xbe3   :  { %v1284_v51 = vmul.f32 %v2932_v45, %v3378_v59 }
 0xc41   :  { %v1186_v42 = vpop.permute.xlu1 %1185 }
 0xc42   :  { %v1188_v43 = vmul.f32 %v2930_v41, %v1186_v42  ;;  %v3067_v42 = vmov 6  }
 0xc44   :  { %1190 = vrot.lane.b32.xlu0 %v1188_v43, %s3061_s14 }
 0xc45   :  { %v1287_v46 = vpop.permute.xlu1 %1286 }
 0xc46   :  { %v1289_v47 = vmul.f32 %v2932_v45, %v1287_v46 }
 0xc48   :  { %1291 = vrot.lane.b32.xlu1 %v1289_v47, %s3061_s14 }
 0xcb6   :  { %v1191_v49 = vpop.permute.xlu0 %1190 }
 0xcb7   :  { %v3427_v50 = vadd.f32 %v1191_v49, %v1183_v48  ;;  %v3494_v48 = vld [vmem:[%s3646_s0] sm:$0x3] }
 0xcb9   :  { %2933 = vtanh.f32 %v3427_v50 }
 0xcba   :  { %v1292_v52 = vpop.permute.xlu1 %1291 }
 0xcbb   :  { %v3431_v53 = vadd.f32 %v1292_v52, %v1284_v51  ;;  %v3510_v51 = vld [vmem:[%s3648_s2 + $0x10] sm:$0xff] }
 0xcbd   :  { %2935 = vtanh.f32 %v3431_v53 }
 0xcc6   :  { %v2934_v54 = vpop.eup %2933 }
 0xcc7   :  { %1196 = vrot.lane.b32.xlu0 %v2934_v54, %s3060_s13  ;;  %v3527_v54 = vld [vmem:[%s3648_s2] sm:$0xff] }
 0xcca   :  { %v2936_v55 = vpop.eup %2935 }
 0xccb   :  { %1297 = vrot.lane.b32.xlu1 %v2936_v55, %s3060_s13  ;;  %v3559_v55 = vld [vmem:[%s3649_s3] ss:$0 sm:$0xff] }
 0xd39   :  { %v1197_v56 = vpop.permute.xlu0 %1196 }
 0xd3a   :  { %v1199_v58 = vmul.f32 %v2930_v41, %v1197_v56 }
 0xd3c   :  { %1302 = vrot.lane.b32.xlu0 %v1199_v58, %s3061_s14 }
 0xd3d   :  { %v1298_v60 = vpop.permute.xlu1 %1297 }
 0xd3e   :  { %v1300_v61 = vmul.f32 %v2932_v45, %v1298_v60 }
 0xd40   :  { %1377 = vrot.lane.b32.xlu1 %v1300_v61, %s3061_s14  ;;  %1477 = vperm.xlu0 %2862, %v3148_v5  }
 0xd44   :  { %2863 = vset.pattern.permute.xlu0 %v3067_v42 }
 0xdae   :  { %v1303_v59 = vpop.permute.xlu0 %1302 }
 0xdaf   :  { %2718 = vmatmul.mubr.msk.f32.vlgmr.msra.gmra.mxu1 %vm103_vm1, %v1303_v59 }
 0xdb0   :  { %2732 = vmatpush3.msra.mxu1 %v3137_v3  ;;  %2739 = vmatprep.mubr.msk.f32.mxu1 %vm3058_vm0, %v3057_v1 }
 0xdb1   :  { %2733 = vmatprep.subr.mxu1 %v3057_v1 }
 0xdb2   :  { %2734 = vmatpush3.msra.mxu1 %v3142_v4  ;;  %v1378_v63 = vpop.permute.xlu1 %1377 }
 0xdb3   :  { %2735 = vmatprep.subr.mxu1 %v3057_v1  ;;  %2729 = vmatmul.mubr.msk.f32.vlgmr.msra.gmra.mxu0 %vm103_vm1, %v1378_v63 }
 0xdb4   :  { %2736 = vmatpush3.msra.mxu1 %v3154_v6  ;;  %2743 = vmatpush3.msra.mxu0 %v3188_v26 }
 0xdb5   :  { %2737 = vmatprep.subr.mxu1 %v3057_v1  ;;  %2744 = vmatprep.subr.mxu0 %v3057_v1 }
 0xdb6   :  { %2738 = vmatpush3.msra.mxu1 %v3162_v7  ;;  %2745 = vmatpush3.msra.mxu0 %v3190_v27 }
 0xdb7   :  { %2740 = vmatmul.mubr.msk.f32.vlgmr.msra.gmra.mxu1 %vm103_vm1, %v1378_v63  ;;  %2746 = vmatprep.subr.mxu0 %v3057_v1 }
 0xdb8   :  { %2747 = vmatpush3.msra.mxu0 %v3198_v30  ;;  %2753 = vmatprep.subr.mxu1 %v3057_v1 }
 0xdb9   :  { %2748 = vmatprep.subr.mxu0 %v3057_v1  ;;  %2754 = vmatpush3.msra.mxu1 %v3193_v28 }
 0xdba   :  { %2749 = vmatpush3.msra.mxu0 %v3206_v32  ;;  %2755 = vmatprep.subr.mxu1 %v3057_v1 }
 0xdbb   :  { %2750 = vmatprep.mubr.msk.f32.mxu0 %vm3058_vm0, %v3057_v1  ;;  %2756 = vmatpush3.msra.mxu1 %v3195_v29  ;;  %v1478_v3 = vpop.permute.xlu0 %1477 }
 0xdbc   :  { %2764 = vmatprep.subr.mxu0 %v3057_v1  ;;  %2757 = vmatprep.subr.mxu1 %v3057_v1  ;;  %v1480_v5 = vmul.f32 %v3174_v9, %v1478_v3 }
 0xdbd   :  { %2758 = vmatpush3.msra.mxu1 %v3203_v31  ;;  %2761 = vmatprep.mubr.msk.f32.mxu1 %vm3058_vm0, %v3057_v1 }
 0xdbe   :  { %2759 = vmatprep.subr.mxu1 %v3057_v1  ;;  %v1481_v0 = vadd.f32 %v3180_v11, %v1480_v5 }
 0xdbf   :  { %2760 = vmatpush3.msra.mxu1 %v3213_v33 }
 0xdc0   :  { %2775 = vmatprep.subr.mxu1 %v3057_v1 }
 0xe6f   :  { %v1372_v4 = vpop.f32.mrf.mxu1 }
 0xe71   :  { %v2719_v6 = vpop.f32.mrf.mxu1 }
 0xe73   :  { %v1447_v7 = vpop.f32.mrf.mxu0 }
 0xe74   :  { %v1448_v62 = vadd.f32 %v1447_v7, %v1372_v4 }
 0xe75   :  { %v2730_v8 = vpop.f32.mrf.mxu0 }
 0xe76   :  { %v1451_v10 = vadd.f32 %v3261_v44, %v1448_v62 }
 0xe77   :  { %v1548_v2 = vpop.f32.mrf.mxu1 }
 0xe78   :  { %2937 = vtanh.f32 %v1451_v10  ;;  %v1552_v13 = vadd.f32 %v1548_v2, %v1481_v0  ;;  %v2423_v9 = vmul.f32 -1.442695, %v1451_v10 }
 0xe79   :  { %v2741_v14 = vpop.f32.mrf.mxu1 }
 0xe7a   :  { %2939 = vtanh.f32 %v1552_v13  ;;  %v2425_v17 = vmul.f32 -1.442695, %v1552_v13 }
 0xe7b   :  { %2941 = vpow2.f32 %v2423_v9 }
 0xe7c   :  { %2943 = vpow2.f32 %v2425_v17 }
 0xe85   :  { %v2938_v15 = vpop.eup %2937 }
 0xe86   :  { %1461 = vrot.lane.b32.xlu1 %v2938_v15, %s3060_s13 }
 0xe87   :  { %v2940_v16 = vpop.eup %2939 }
 0xe88   :  { %v2942_v12 = vpop.eup %2941 }
 0xe89   :  { %v1455_v11 = vadd.f32 1.0, %v2942_v12  ;;  %v2944_v18 = vpop.eup %2943 }
 0xe8a   :  { %1562 = vrot.lane.b32.xlu1 %v2940_v16, %s3060_s13  ;;  %v1556_v19 = vadd.f32 1.0, %v2944_v18 }
 0xe8b   :  { %2945 = vrcp.f32 %v1455_v11 }
 0xe8c   :  { %2947 = vrcp.f32 %v1556_v19  ;;  %v3068_v19 = vmov 7  }
 0xe98   :  { %v2946_v20 = vpop.eup %2945 }
 0xe99   :  { %v2948_v23 = vpop.eup %2947  ;;  %v1459_v34 = vmul.f32 %v2946_v20, %v3427_v50  ;;  %v3501_v50 = vld [vmem:[%s3648_s2 + $0x18] sm:$0xff] }
 0xe9a   :  { %v1560_v37 = vmul.f32 %v2948_v23, %v3431_v53  ;;  %v3518_v53 = vld [vmem:[%s3648_s2 + $0x8] sm:$0xff] }
 0xef8   :  { %v1462_v21 = vpop.permute.xlu1 %1461 }
 0xef9   :  { %v1464_v22 = vmul.f32 %v2946_v20, %v1462_v21 }
 0xefb   :  { %1466 = vrot.lane.b32.xlu0 %v1464_v22, %s3061_s14 }
 0xefc   :  { %v1563_v24 = vpop.permute.xlu1 %1562 }
 0xefd   :  { %v1565_v25 = vmul.f32 %v2948_v23, %v1563_v24 }
 0xeff   :  { %1567 = vrot.lane.b32.xlu1 %v1565_v25, %s3061_s14 }
 0xf6d   :  { %v1467_v35 = vpop.permute.xlu0 %1466 }
 0xf6e   :  { %v3480_v36 = vadd.f32 %v1467_v35, %v1459_v34  ;;  %v3000_v34 = vld [vmem:[#allocation5 + $0x18] sm:$0xff]  ;;  %v3001_v35 = vld [vmem:[#allocation5 + $0x10] sm:$0xff] }
 0xf70   :  { %2949 = vtanh.f32 %v3480_v36 }
 0xf71   :  { %v1568_v38 = vpop.permute.xlu1 %1567 }
 0xf72   :  { %v3484_v39 = vadd.f32 %v1568_v38, %v1560_v37  ;;  %v3003_v37 = vld [vmem:[#allocation3 + $0x18] sm:$0xff]  ;;  %v3004_v38 = vld [vmem:[#allocation5] sm:$0xff] }
 0xf74   :  { %2951 = vtanh.f32 %v3484_v39 }
 0xf7d   :  { %v2950_v40 = vpop.eup %2949 }
 0xf7e   :  { %1472 = vrot.lane.b32.xlu0 %v2950_v40, %s3060_s13  ;;  %v3006_v40 = vld [vmem:[#allocation3 + $0x8] sm:$0xff] }
 0xf81   :  { %v2952_v41 = vpop.eup %2951 }
 0xf82   :  { %1573 = vrot.lane.b32.xlu1 %v2952_v41, %s3060_s13  ;;  %v3007_v41 = vld [vmem:[#allocation3] sm:$0xff] }
 0xff0   :  { %v1473_v43 = vpop.permute.xlu0 %1472 }
 0xff1   :  { %v1475_v45 = vmul.f32 %v2946_v20, %v1473_v43 }
 0xff3   :  { %1578 = vrot.lane.b32.xlu0 %v1475_v45, %s3061_s14 }
 0xff4   :  { %v1574_v46 = vpop.permute.xlu1 %1573 }
 0xff5   :  { %v1576_v47 = vmul.f32 %v2948_v23, %v1574_v46 }
 0xff7   :  { %1653 = vrot.lane.b32.xlu1 %v1576_v47, %s3061_s14  ;;  %1753 = vperm.xlu0 %2863, %v3494_v48  }
 0xffb   :  { %2864 = vset.pattern.permute.xlu0 %v3068_v19 }
0x1065   :  { %v1579_v49 = vpop.permute.xlu0 %1578 }
0x1066   :  { %2751 = vmatmul.mubr.msk.f32.vlgmr.msra.gmra.mxu0 %vm103_vm1, %v1579_v49 }
0x1067   :  { %2765 = vmatpush3.msra.mxu0 %v3501_v50  ;;  %2772 = vmatprep.mubr.msk.f32.mxu0 %vm3058_vm0, %v3057_v1 }
0x1068   :  { %2766 = vmatprep.subr.mxu0 %v3057_v1 }
0x1069   :  { %2767 = vmatpush3.msra.mxu0 %v3510_v51  ;;  %v1654_v52 = vpop.permute.xlu1 %1653 }
0x106a   :  { %2768 = vmatprep.subr.mxu0 %v3057_v1  ;;  %2762 = vmatmul.mubr.msk.f32.vlgmr.msra.gmra.mxu1 %vm103_vm1, %v1654_v52 }
0x106b   :  { %2769 = vmatpush3.msra.mxu0 %v3518_v53  ;;  %2776 = vmatpush3.msra.mxu1 %v3188_v26 }
0x106c   :  { %2770 = vmatprep.subr.mxu0 %v3057_v1  ;;  %2777 = vmatprep.subr.mxu1 %v3057_v1 }
0x106d   :  { %2771 = vmatpush3.msra.mxu0 %v3527_v54  ;;  %2778 = vmatpush3.msra.mxu1 %v3190_v27 }
0x106e   :  { %2773 = vmatmul.mubr.msk.f32.vlgmr.msra.gmra.mxu0 %vm103_vm1, %v1654_v52  ;;  %2779 = vmatprep.subr.mxu1 %v3057_v1 }
0x106f   :  { %2780 = vmatpush3.msra.mxu1 %v3198_v30  ;;  %2786 = vmatprep.subr.mxu0 %v3057_v1 }
0x1070   :  { %2781 = vmatprep.subr.mxu1 %v3057_v1  ;;  %2787 = vmatpush3.msra.mxu0 %v3193_v28  ;;  %v3553_v28 = vld [vmem:[%s3647_s1] ss:$0 sm:$0xff] }
0x1071   :  { %2782 = vmatpush3.msra.mxu1 %v3206_v32  ;;  %2788 = vmatprep.subr.mxu0 %v3057_v1 }
0x1072   :  { %2783 = vmatprep.mubr.msk.f32.mxu1 %vm3058_vm0, %v3057_v1  ;;  %2789 = vmatpush3.msra.mxu0 %v3195_v29  ;;  %v1754_v26 = vpop.permute.xlu0 %1753 }
0x1073   :  { %2797 = vmatprep.subr.mxu1 %v3057_v1  ;;  %2790 = vmatprep.subr.mxu0 %v3057_v1  ;;  %v1756_v29 = vmul.f32 %v3553_v28, %v1754_v26 }
0x1074   :  { %2791 = vmatpush3.msra.mxu0 %v3203_v31  ;;  %2794 = vmatprep.mubr.msk.f32.mxu0 %vm3058_vm0, %v3057_v1 }
0x1075   :  { %2792 = vmatprep.subr.mxu0 %v3057_v1 }
0x1076   :  { %2793 = vmatpush3.msra.mxu0 %v3213_v33  ;;  %v1757_v33 = vadd.f32 %v3559_v55, %v1756_v29 }
0x1077   :  { %2808 = vmatprep.subr.mxu0 %v3057_v1 }
0x1126   :  { %v1648_v27 = vpop.f32.mrf.mxu0 }
0x1128   :  { %v2752_v30 = vpop.f32.mrf.mxu0 }
0x112a   :  { %v1723_v31 = vpop.f32.mrf.mxu1 }
0x112b   :  { %v1724_v32 = vadd.f32 %v1723_v31, %v1648_v27 }
0x112c   :  { %v2763_v57 = vpop.f32.mrf.mxu1 }
0x112d   :  { %v1727_v56 = vadd.f32 %v3261_v44, %v1724_v32 }
0x112e   :  { %v1824_v58 = vpop.f32.mrf.mxu0 }
0x112f   :  { %2953 = vtanh.f32 %v1727_v56  ;;  %v1828_v60 = vadd.f32 %v1824_v58, %v1757_v33  ;;  %v2428_v3 = vmul.f32 -1.442695, %v1727_v56 }
0x1130   :  { %v2774_v61 = vpop.f32.mrf.mxu0 }
0x1131   :  { %2955 = vtanh.f32 %v1828_v60  ;;  %v2430_v4 = vmul.f32 -1.442695, %v1828_v60 }
0x1132   :  { %2957 = vpow2.f32 %v2428_v3 }
0x1133   :  { %2959 = vpow2.f32 %v2430_v4 }
0x113c   :  { %v2954_v59 = vpop.eup %2953 }
0x113d   :  { %1737 = vrot.lane.b32.xlu1 %v2954_v59, %s3060_s13 }
0x113e   :  { %v2956_v63 = vpop.eup %2955 }
0x113f   :  { %v2958_v5 = vpop.eup %2957 }
0x1140   :  { %v1731_v6 = vadd.f32 1.0, %v2958_v5  ;;  %v2960_v7 = vpop.eup %2959 }
0x1141   :  { %1838 = vrot.lane.b32.xlu1 %v2956_v63, %s3060_s13  ;;  %v1832_v44 = vadd.f32 1.0, %v2960_v7 }
0x1142   :  { %2961 = vrcp.f32 %v1731_v6 }
0x1143   :  { %2963 = vrcp.f32 %v1832_v44 }
0x114f   :  { %v2962_v62 = vpop.eup %2961 }
0x1150   :  { %v2964_v10 = vpop.eup %2963  ;;  %v1735_v14 = vmul.f32 %v2962_v62, %v3480_v36  ;;  %v3002_v36 = vld [vmem:[#allocation5 + $0x8] sm:$0xff] }
0x1151   :  { %v1836_v9 = vmul.f32 %v2964_v10, %v3484_v39  ;;  %v3005_v39 = vld [vmem:[#allocation3 + $0x10] sm:$0xff] }
0x11af   :  { %v1738_v0 = vpop.permute.xlu1 %1737 }
0x11b0   :  { %v1740_v8 = vmul.f32 %v2962_v62, %v1738_v0 }
0x11b2   :  { %1742 = vrot.lane.b32.xlu0 %v1740_v8, %s3061_s14 }
0x11b3   :  { %v1839_v2 = vpop.permute.xlu1 %1838 }
0x11b4   :  { %v1841_v13 = vmul.f32 %v2964_v10, %v1839_v2 }
0x11b6   :  { %1843 = vrot.lane.b32.xlu1 %v1841_v13, %s3061_s14 }
0x1224   :  { %v1743_v15 = vpop.permute.xlu0 %1742 }
0x1225   :  { %v3568_v16 = vadd.f32 %v1743_v15, %v1735_v14 }
0x1227   :  { %2965 = vtanh.f32 %v3568_v16 }
0x1228   :  { %v1844_v17 = vpop.permute.xlu1 %1843 }
0x1229   :  { %v3572_v12 = vadd.f32 %v1844_v17, %v1836_v9 }
0x122b   :  { %2967 = vtanh.f32 %v3572_v12 }
0x1234   :  { %v2966_v11 = vpop.eup %2965 }
0x1235   :  { %1748 = vrot.lane.b32.xlu0 %v2966_v11, %s3060_s13 }
0x1238   :  { %v2968_v18 = vpop.eup %2967 }
0x1239   :  { %1849 = vrot.lane.b32.xlu1 %v2968_v18, %s3060_s13 }
0x12a7   :  { %v1749_v20 = vpop.permute.xlu0 %1748 }
0x12a8   :  { %v1751_v21 = vmul.f32 %v2962_v62, %v1749_v20 }
0x12aa   :  { %1854 = vrot.lane.b32.xlu0 %v1751_v21, %s3061_s14 }
0x12ab   :  { %v1850_v22 = vpop.permute.xlu1 %1849 }
0x12ac   :  { %v1852_v23 = vmul.f32 %v2964_v10, %v1850_v22 }
0x12ae   :  { %1929 = vrot.lane.b32.xlu1 %v1852_v23, %s3061_s14  ;;  %2029 = vperm.xlu0 %2864, %v3494_v48  }
0x131c   :  { %v1855_v24 = vpop.permute.xlu0 %1854 }
0x131d   :  { %2784 = vmatmul.mubr.msk.f32.vlgmr.msra.gmra.mxu1 %vm103_vm1, %v1855_v24 }
0x131e   :  { %2798 = vmatpush3.msra.mxu1 %v3501_v50  ;;  %2805 = vmatprep.mubr.msk.f32.mxu1 %vm3058_vm0, %v3057_v1 }
0x131f   :  { %2799 = vmatprep.subr.mxu1 %v3057_v1 }
0x1320   :  { %2800 = vmatpush3.msra.mxu1 %v3510_v51  ;;  %v1930_v25 = vpop.permute.xlu1 %1929  ;;  %v3008_v51 = vld [vmem:[%s3652_s6] ss:$0 sm:$0xff] }
0x1321   :  { %2801 = vmatprep.subr.mxu1 %v3057_v1  ;;  %2795 = vmatmul.mubr.msk.f32.vlgmr.msra.gmra.mxu0 %vm103_vm1, %v1930_v25 }
0x1322   :  { %2802 = vmatpush3.msra.mxu1 %v3518_v53  ;;  %2809 = vmatpush3.msra.mxu0 %v3000_v34 }
0x1323   :  { %2803 = vmatprep.subr.mxu1 %v3057_v1  ;;  %2810 = vmatprep.subr.mxu0 %v3057_v1 }
0x1324   :  { %2804 = vmatpush3.msra.mxu1 %v3527_v54  ;;  %2811 = vmatpush3.msra.mxu0 %v3001_v35 }
0x1325   :  { %2806 = vmatmul.mubr.msk.f32.vlgmr.msra.gmra.mxu1 %vm103_vm1, %v1930_v25  ;;  %2812 = vmatprep.subr.mxu0 %v3057_v1 }
0x1326   :  { %2819 = vmatprep.subr.mxu1 %v3057_v1  ;;  %2813 = vmatpush3.msra.mxu0 %v3002_v36  ;;  %v2307_v36 = vld [vmem:[%s3653_s7 + $0x18] sm:$0xff] }
0x1327   :  { %2820 = vmatpush3.msra.mxu1 %v3003_v37  ;;  %2814 = vmatprep.subr.mxu0 %v3057_v1  ;;  %v2306_v37 = vld [vmem:[%s3653_s7 + $0x10] sm:$0xff] }
0x1328   :  { %2821 = vmatprep.subr.mxu1 %v3057_v1  ;;  %2815 = vmatpush3.msra.mxu0 %v3004_v38  ;;  %v2305_v38 = vld [vmem:[%s3653_s7 + $0x8] sm:$0xff] }
0x1329   :  { %2816 = vmatprep.mubr.msk.f32.mxu0 %vm3058_vm0, %v3057_v1  ;;  %2822 = vmatpush3.msra.mxu1 %v3005_v39  ;;  %v2030_v42 = vpop.permute.xlu0 %2029  ;;  %v2304_v39 = vld [vmem:[%s3653_s7] sm:$0xff] }
0x132a   :  { %2823 = vmatprep.subr.mxu1 %v3057_v1  ;;  %2827 = vmatprep.mubr.msk.f32.mxu1 %vm3058_vm0, %v3057_v1  ;;  %v2032_v45 = vmul.f32 %v3553_v28, %v2030_v42 }
0x132b   :  { %2824 = vmatpush3.msra.mxu1 %v3006_v40  ;;  %2830 = vmatprep.subr.mxu0 %v3057_v1 }
0x132c   :  { %2825 = vmatprep.subr.mxu1 %v3057_v1  ;;  %v2033_v49 = vadd.f32 %v3559_v55, %v2032_v45  ;;  %v2439_v45 = vld [vmem:[#allocation2] ss:$0 sm:$0xff] }
0x132d   :  { %2826 = vmatpush3.msra.mxu1 %v3007_v41 }
0x13dd   :  { %v1924_v43 = vpop.f32.mrf.mxu1 }
0x13df   :  { %v2785_v46 = vpop.f32.mrf.mxu1 }
0x13e1   :  { %v1999_v47 = vpop.f32.mrf.mxu0 }
0x13e2   :  { %v2000_v48 = vadd.f32 %v1999_v47, %v1924_v43 }
0x13e3   :  { %v2796_v50 = vpop.f32.mrf.mxu0 }
0x13e4   :  { %v2003_v52 = vadd.f32 %v3008_v51, %v2000_v48 }
0x13e5   :  { %v2100_v53 = vpop.f32.mrf.mxu1 }
0x13e6   :  { %2969 = vtanh.f32 %v2003_v52  ;;  %v2104_v54 = vadd.f32 %v2100_v53, %v2033_v49  ;;  %v2433_v29 = vmul.f32 -1.442695, %v2003_v52 }
0x13e7   :  { %v2807_v26 = vpop.f32.mrf.mxu1 }
0x13e8   :  { %2971 = vtanh.f32 %v2104_v54  ;;  %v2435_v30 = vmul.f32 -1.442695, %v2104_v54 }
0x13e9   :  { %2973 = vpow2.f32 %v2433_v29 }
0x13ea   :  { %2975 = vpow2.f32 %v2435_v30 }
0x13f3   :  { %v2970_v27 = vpop.eup %2969 }
0x13f4   :  { %2013 = vrot.lane.b32.xlu1 %v2970_v27, %s3060_s13 }
0x13f5   :  { %v2972_v28 = vpop.eup %2971 }
0x13f6   :  { %v2974_v31 = vpop.eup %2973 }
0x13f7   :  { %v2007_v32 = vadd.f32 1.0, %v2974_v31  ;;  %v2976_v55 = vpop.eup %2975 }
0x13f8   :  { %2114 = vrot.lane.b32.xlu1 %v2972_v28, %s3060_s13  ;;  %v2108_v33 = vadd.f32 1.0, %v2976_v55 }
0x13f9   :  { %2977 = vrcp.f32 %v2007_v32 }
0x13fa   :  { %2979 = vrcp.f32 %v2108_v33 }
0x1406   :  { %v2978_v57 = vpop.eup %2977 }
0x1407   :  { %v2980_v60 = vpop.eup %2979  ;;  %v2011_v63 = vmul.f32 %v2978_v57, %v3568_v16 }
0x1408   :  { %v2112_v5 = vmul.f32 %v2980_v60, %v3572_v12 }
0x1466   :  { %v2014_v56 = vpop.permute.xlu1 %2013 }
0x1467   :  { %v2016_v58 = vmul.f32 %v2978_v57, %v2014_v56 }
0x1469   :  { %2018 = vrot.lane.b32.xlu0 %v2016_v58, %s3061_s14 }
0x146a   :  { %v2115_v61 = vpop.permute.xlu1 %2114 }
0x146b   :  { %v2117_v59 = vmul.f32 %v2980_v60, %v2115_v61 }
0x146d   :  { %2119 = vrot.lane.b32.xlu1 %v2117_v59, %s3061_s14 }
0x14db   :  { %v2019_v3 = vpop.permute.xlu0 %2018 }
0x14dc   :  { %v2021_v4 = vadd.f32 %v2019_v3, %v2011_v63 }
0x14de   :  { %2981 = vtanh.f32 %v2021_v4 }
0x14df   :  { %v2120_v6 = vpop.permute.xlu1 %2119 }
0x14e0   :  { %v2122_v7 = vadd.f32 %v2120_v6, %v2112_v5 }
0x14e2   :  { %2983 = vtanh.f32 %v2122_v7 }
0x14eb   :  { %v2982_v44 = vpop.eup %2981 }
0x14ec   :  { %2024 = vrot.lane.b32.xlu0 %v2982_v44, %s3060_s13 }
0x14ef   :  { %v2984_v62 = vpop.eup %2983 }
0x14f0   :  { %2125 = vrot.lane.b32.xlu1 %v2984_v62, %s3060_s13 }
0x155e   :  { %v2025_v0 = vpop.permute.xlu0 %2024 }
0x155f   :  { %v2027_v8 = vmul.f32 %v2978_v57, %v2025_v0 }
0x1561   :  { %2130 = vrot.lane.b32.xlu0 %v2027_v8, %s3061_s14 }
0x1562   :  { %v2126_v10 = vpop.permute.xlu1 %2125 }
0x1563   :  { %v2128_v2 = vmul.f32 %v2980_v60, %v2126_v10 }
0x1565   :  { %2205 = vrot.lane.b32.xlu1 %v2128_v2, %s3061_s14 }
0x15d3   :  { %v2131_v13 = vpop.permute.xlu0 %2130 }
0x15d4   :  { %2817 = vmatmul.mubr.msk.f32.vlgmr.msra.gmra.mxu0 %vm103_vm1, %v2131_v13 }
0x15d5   :  { %2838 = vmatprep.mubr.msk.f32.mxu0 %vm3058_vm0, %v3057_v1  ;;  %2831 = vmatpush3.msra.mxu0 %v2307_v36 }
0x15d6   :  { %2832 = vmatprep.subr.mxu0 %v3057_v1 }
0x15d7   :  { %v2206_v14 = vpop.permute.xlu1 %2205  ;;  %2833 = vmatpush3.msra.mxu0 %v2306_v37 }
0x15d8   :  { %2828 = vmatmul.mubr.msk.f32.vlgmr.msra.gmra.mxu1 %vm103_vm1, %v2206_v14  ;;  %2834 = vmatprep.subr.mxu0 %v3057_v1 }
0x15d9   :  { %2835 = vmatpush3.msra.mxu0 %v2305_v38 }
0x15da   :  { %2836 = vmatprep.subr.mxu0 %v3057_v1 }
0x15db   :  { %2837 = vmatpush3.msra.mxu0 %v2304_v39 }
0x1694   :  { %v2200_v15 = vpop.f32.mrf.mxu0 }
0x1696   :  { %v2818_v16 = vpop.f32.mrf.mxu0 }
0x1698   :  { %v2275_v9 = vpop.f32.mrf.mxu1 }
0x1699   :  { %v2276_v17 = vadd.f32 %v2275_v9, %v2200_v15 }
0x169a   :  { %v2829_v12 = vpop.f32.mrf.mxu1 }
0x169b   :  { %v2279_v11 = vadd.f32 %v3008_v51, %v2276_v17 }
0x169d   :  { %2985 = vtanh.f32 %v2279_v11  ;;  %v2438_v19 = vmul.f32 -1.442695, %v2279_v11 }
0x169f   :  { %2987 = vpow2.f32 %v2438_v19 }
0x16aa   :  { %v2986_v18 = vpop.eup %2985 }
0x16ab   :  { %2289 = vrot.lane.b32.xlu0 %v2986_v18, %s3060_s13 }
0x16ac   :  { %v2988_v20 = vpop.eup %2987 }
0x16ad   :  { %v2283_v21 = vadd.f32 1.0, %v2988_v20 }
0x16af   :  { %2989 = vrcp.f32 %v2283_v21 }
0x16bc   :  { %v2990_v22 = vpop.eup %2989 }
0x16bd   :  { %v2287_v25 = vmul.f32 %v2990_v22, %v2021_v4 }
0x171d   :  { %v2290_v23 = vpop.permute.xlu0 %2289 }
0x171e   :  { %v2292_v24 = vmul.f32 %v2990_v22, %v2290_v23 }
0x1720   :  { %2294 = vrot.lane.b32.xlu1 %v2292_v24, %s3061_s14 }
0x1792   :  { %v2295_v34 = vpop.permute.xlu1 %2294 }
0x1793   :  { %v2297_v35 = vadd.f32 %v2295_v34, %v2287_v25 }
0x1795   :  { %2991 = vtanh.f32 %v2297_v35 }
0x17a2   :  { %v2992_v40 = vpop.eup %2991 }
0x17a3   :  { %2300 = vrot.lane.b32.xlu0 %v2992_v40, %s3060_s13 }
0x1815   :  { %v2301_v41 = vpop.permute.xlu0 %2300 }
0x1816   :  { %v2303_v42 = vmul.f32 %v2990_v22, %v2301_v41 }
0x1818   :  { %2316 = vrot.lane.b32.xlu1 %v2303_v42, %s3061_s14 }
0x188a   :  { %v2317_v43 = vpop.permute.xlu1 %2316 }
0x188b   :  { %2839 = vmatmul.mubr.msk.f32.vlgmr.msra.gmra.mxu0 %vm103_vm1, %v2317_v43 }
0x194b   :  { %v2386_v46 = vpop.f32.mrf.mxu0 }
0x194c   :  { %v2387_v47 = vadd.f32 %v2439_v45, %v2386_v46 }
0x194d   :  { %v2840_v48 = vpop.f32.mrf.mxu0 }
0x194e   :  { %2391 = vst.msk [vmem:[%s3655_s9] sm:$0x3] %vm2390_vm2, %v2387_v47 }
0x194f   :  { %2396 = vsyncpa [#allocation4], 1 }
0x1950   :  { %2397 = vsyncpa [#allocation6], 1 }

</bundles_post_ra>
